<compile_context>
chip_gen: v7x
topology: tpu7x:2x2x1
jax: 0.10.0
libtpu: 0.0.40
codegen_flags: <defaults>
</compile_context>

<pallas_src>
import math
from functools import partial

import jax
import jax.numpy as jnp
from jax.experimental import pallas as pl
from jax.experimental.pallas import tpu as pltpu

LN_EPS = 1e-6   # Transformer builds its Blocks with nn.LayerNorm(eps=1e-6)
BN_EPS = 1e-5

PARAM_ORDER = ('ln1w', 'ln1b', 'wqkv', 'bqkv', 'wproj', 'bproj',
               'ln2w', 'ln2b',
               'w1', 'b1', 'bn1s', 'bn1t',
               'wdw', 'bdw', 'bn2s', 'bn2t',
               'w2', 'b2', 'bn3s', 'bn3t')


def _erf(x, approx_recip=False):
    # Abramowitz & Stegun 7.1.26 rational approximation (|err| < 1.5e-7).
    a1, a2, a3, a4, a5 = 0.254829592, -0.284496736, 1.421413741, -1.453152027, 1.061405429
    p = 0.3275911
    sgn = jnp.where(x >= 0.0, 1.0, -1.0)
    ax = jnp.abs(x)
    denom = 1.0 + p * ax
    # In-kernel: the divide goes to the otherwise-idle EUP (approx reciprocal), not the VALU.
    t = pl.reciprocal(denom, approx=True) if approx_recip else 1.0 / denom
    poly = ((((a5 * t + a4) * t + a3) * t + a2) * t + a1) * t
    return sgn * (1.0 - poly * jnp.exp(-ax * ax))


def _gelu(x, approx_recip=False):
    # PyTorch nn.GELU() default = exact (erf-based) GELU.
    return 0.5 * x * (1.0 + _erf(x * (1.0 / math.sqrt(2.0)), approx_recip))


def _layernorm(x, w, b):
    mu = jnp.mean(x, axis=-1, keepdims=True)
    var = jnp.mean((x - mu) ** 2, axis=-1, keepdims=True)
    return (x - mu) * jax.lax.rsqrt(var + LN_EPS) * w + b


# ----------------------------------------------------------------------------
# Pallas kernel: one Block layer per grid step, depth fused on the inner grid axis.
# Grid = (B // bt, depth); the activation for the current batch tile stays resident in
# act_ref across the whole depth loop.
# ----------------------------------------------------------------------------
def transformer_kernel(num_heads, hs, ws,
                       x_ref, bias_ref,
                       ln1w, ln1b, wqkv, bqkv, wproj, bproj,
                       ln2w, ln2b,
                       w1, b1, bn1s, bn1t,
                       wdw, bdw, bn2s, bn2t,
                       w2, b2, bn3s, bn3t,
                       o_ref, act_ref, pad_ref):
    bt, n_tok, c = x_ref.shape
    t = bt * n_tok                              # flattened rows per grid step
    hd = c // num_heads
    scale = 1.0 / math.sqrt(hd)
    hidden = pad_ref.shape[-1]

    d_idx = pl.program_id(1)

    # First layer of this batch tile: load activation into the resident VMEM buffer and
    # zero the halo image once (only its interior is rewritten each layer, border stays 0).
    @pl.when(d_idx == 0)
    def _():
        act_ref[...] = x_ref[...].reshape(t, c)
        pad_ref[...] = jnp.zeros(pad_ref.shape, pad_ref.dtype)

    x = act_ref[...]                            # (T, C) f32, carried across layers

    # ---------------- attention branch ----------------
    y = _layernorm(x, ln1w[0], ln1b[0])
    qkv = jnp.dot(y.astype(jnp.bfloat16), wqkv[0],
                  preferred_element_type=jnp.float32) + bqkv[0]          # (T, 3C)

    # Host-precomputed block-diagonal additive mask (keeps softmax per batch element);
    # statically skipped when a grid step holds a single batch element.
    attn_bias = bias_ref[...] if bt > 1 else None

    head_outs = []
    for h in range(num_heads):                  # static unrolled loop; outputs stay in vregs
        q = qkv[:, h * hd:(h + 1) * hd].astype(jnp.bfloat16)
        k = qkv[:, c + h * hd:c + (h + 1) * hd].astype(jnp.bfloat16)
        v = qkv[:, 2 * c + h * hd:2 * c + (h + 1) * hd].astype(jnp.bfloat16)
        # contract last dims of both operands -> no explicit k.T transpose
        s = jax.lax.dot_general(q, k, (((1,), (1,)), ((), ())),
                                preferred_element_type=jnp.float32) * scale
        if attn_bias is not None:
            s = s + attn_bias
        s = s - jnp.max(s, axis=-1, keepdims=True)
        p = jnp.exp(s)
        p = p * pl.reciprocal(jnp.sum(p, axis=-1, keepdims=True), approx=True)
        head_outs.append(jnp.dot(p.astype(jnp.bfloat16), v,
                                 preferred_element_type=jnp.float32))
    attn = jnp.concatenate(head_outs, axis=-1)                           # (T, C)
    attn = jnp.dot(attn.astype(jnp.bfloat16), wproj[0],
                   preferred_element_type=jnp.float32) + bproj[0]
    x1 = x + attn                                                        # first residual

    # ---------------- MLP (conv) branch ----------------
    y2 = _layernorm(x1, ln2w[0], ln2b[0])
    h1 = jnp.dot(y2.astype(jnp.bfloat16), w1[0],
                 preferred_element_type=jnp.float32) + b1[0]
    h1 = h1 * bn1s[0] + bn1t[0]                                          # folded BatchNorm2d (bn1)
    h1 = _gelu(h1, approx_recip=True)                                    # (T, hidden)

    # Depthwise 3x3 conv (padding=1): write the interior of the zero-padded halo image once,
    # then accumulate 9 unmasked shifted windows (no rolls, no validity masks).
    pad_ref[:, 1:hs + 1, 1:ws + 1, :] = h1.reshape(bt, hs, ws, hidden)
    taps = wdw[0]                                                        # (9, hidden)
    acc = None
    for dy in range(3):
        for dx in range(3):
            j = 3 * dy + dx
            win = pad_ref[:, dy:dy + hs, dx:dx + ws, :]                  # (bt, hs, ws, hidden)
            term = win * taps[j:j + 1, :]
            acc = term if acc is None else acc + term
    h2 = acc.reshape(t, hidden) + bdw[0]
    h2 = h2 * bn2s[0] + bn2t[0]                                          # folded bn2
    h2 = _gelu(h2, approx_recip=True)

    h3 = jnp.dot(h2.astype(jnp.bfloat16), w2[0],
                 preferred_element_type=jnp.float32) + b2[0]
    h3 = h3 * bn3s[0] + bn3t[0]                                          # folded bn3

    out = x1 + h3                                                        # second residual
    act_ref[...] = out                                                   # carry to next layer

    @pl.when(d_idx == pl.num_programs(1) - 1)
    def _():
        o_ref[...] = out.reshape(bt, n_tok, c)                           # single HBM writeback


# ----------------------------------------------------------------------------
# Wrapper: one pallas_call for the whole depth stack.
# ----------------------------------------------------------------------------
def transformer_forward(x, stacked_params, num_heads, hs, ws):
    B, N, C = x.shape
    depth = stacked_params[0].shape[0]
    hidden = stacked_params[PARAM_ORDER.index('w1')].shape[-1]

    # Batch tiling: target ~256 rows (fills the 256-tall v6e/v7x MXU) but cap at B//2 so the
    # "parallel" batch axis has >=2 grid steps (both v7x TensorCores used).
    bt = min(max(1, -(-256 // N)), max(1, B // 2))
    while B % bt:
        bt -= 1
    T = bt * N

    # Host-precomputed block-diagonal additive attention mask (only read when bt > 1).
    if bt > 1:
        blk = jnp.arange(T, dtype=jnp.int32) // N
        attn_bias = jnp.where(blk[:, None] == blk[None, :], 0.0, -1e30).astype(jnp.float32)
    else:
        attn_bias = jnp.zeros((T, T), jnp.float32)   # unused; kernel skips the add statically

    x_spec = pl.BlockSpec((bt, N, C), lambda b, d: (b, 0, 0))
    bias_spec = pl.BlockSpec((T, T), lambda b, d: (0, 0))
    param_specs = []
    for arr in stacked_params:                        # (depth, ...) -> (1, ...) block at layer d
        nrest = arr.ndim - 1
        param_specs.append(
            pl.BlockSpec((1,) + arr.shape[1:],
                         lambda b, d, _n=nrest: (d,) + (0,) * _n))

    kernel = partial(transformer_kernel, num_heads, hs, ws)
    return pl.pallas_call(
        kernel,
        out_shape=jax.ShapeDtypeStruct((B, N, C), jnp.float32),
        grid=(B // bt, depth),
        in_specs=[x_spec, bias_spec] + param_specs,
        out_specs=pl.BlockSpec((bt, N, C), lambda b, d: (b, 0, 0)),
        scratch_shapes=[
            pltpu.VMEM((T, C), jnp.float32),                        # layer-resident activation
            pltpu.VMEM((bt, hs + 2, ws + 2, hidden), jnp.float32),  # zero-padded halo image
        ],
        compiler_params=pltpu.CompilerParams(
            dimension_semantics=("parallel", "arbitrary"),
            vmem_limit_bytes=48 * 1024 * 1024),   # < 64 MiB v7x physical; ample on v5e/v6e
    )(x, attn_bias, *stacked_params)


# ----------------------------------------------------------------------------
# Pure-JAX reference (independent path: einsum attention, exact GELU, lax depthwise conv, f32)
# ----------------------------------------------------------------------------
def ref_block(x, p, num_heads, hs, ws):
    B, N, C = x.shape
    hd = C // num_heads
    scale = hd ** -0.5

    y = _layernorm(x, p['ln1w'], p['ln1b'])
    qkv = y @ p['wqkv'] + p['bqkv']                                   # (B, N, 3C)
    qkv = qkv.reshape(B, N, 3, num_heads, hd).transpose(2, 0, 3, 1, 4)
    q, k, v = qkv[0], qkv[1], qkv[2]
    attn = jnp.einsum('bhnd,bhmd->bhnm', q, k) * scale
    attn = jax.nn.softmax(attn, axis=-1)
    o = jnp.einsum('bhnm,bhmd->bhnd', attn, v)
    o = o.transpose(0, 2, 1, 3).reshape(B, N, C)
    o = o @ p['wproj'] + p['bproj']
    x1 = x + o

    y2 = _layernorm(x1, p['ln2w'], p['ln2b'])
    h = y2 @ p['w1'] + p['b1']
    h = h * p['bn1s'] + p['bn1t']
    h = jax.nn.gelu(h, approximate=False)
    hidden = h.shape[-1]
    himg = h.reshape(B, hs, ws, hidden)
    dw = p['wdw'].reshape(3, 3, 1, hidden)
    conv = jax.lax.conv_general_dilated(
        himg, dw, (1, 1), 'SAME',
        dimension_numbers=('NHWC', 'HWIO', 'NHWC'),
        feature_group_count=hidden)
    h2 = (conv + p['bdw']).reshape(B, N, hidden)
    h2 = h2 * p['bn2s'] + p['bn2t']
    h2 = jax.nn.gelu(h2, approximate=False)
    h3 = h2 @ p['w2'] + p['b2']
    h3 = h3 * p['bn3s'] + p['bn3t']
    return x1 + h3


def reference(x, block_params, num_heads, hs, ws):
    for p in block_params:
        x = ref_block(x, p, num_heads, hs, ws)
    return x


# ----------------------------------------------------------------------------
# Parameter construction
# ----------------------------------------------------------------------------
def make_block_params(key, C, hidden):
    ks = jax.random.split(key, 24)
    nrm = lambda k, shape, s=0.02: s * jax.random.normal(k, shape, jnp.float32)
    p = {}
    p['ln1w'] = (1.0 + nrm(ks[0], (C,), 0.1)).reshape(1, C)
    p['ln1b'] = nrm(ks[1], (C,), 0.1).reshape(1, C)
    p['ln2w'] = (1.0 + nrm(ks[2], (C,), 0.1)).reshape(1, C)
    p['ln2b'] = nrm(ks[3], (C,), 0.1).reshape(1, C)
    # Attention (Transformer builds Blocks with qkv_bias=True)
    p['wqkv'] = nrm(ks[4], (C, 3 * C))
    p['bqkv'] = nrm(ks[5], (3 * C,), 0.01).reshape(1, 3 * C)
    p['wproj'] = nrm(ks[6], (C, C))
    p['bproj'] = nrm(ks[7], (C,), 0.01).reshape(1, C)
    # MLP conv branch (1x1 convs as matmuls, depthwise 3x3 as (9, hidden) taps)
    p['w1'] = nrm(ks[8], (C, hidden))
    p['b1'] = nrm(ks[9], (hidden,), 0.01).reshape(1, hidden)
    p['wdw'] = nrm(ks[10], (9, hidden))
    p['bdw'] = nrm(ks[11], (hidden,), 0.01).reshape(1, hidden)
    p['w2'] = nrm(ks[12], (hidden, C))
    p['b2'] = nrm(ks[13], (C,), 0.01).reshape(1, C)

    # BatchNorms (inference: running stats folded into per-channel scale/shift)
    def bn_params(k, d):
        k1, k2, k3, k4 = jax.random.split(k, 4)
        gamma = 1.0 + 0.1 * jax.random.normal(k1, (d,), jnp.float32)
        beta = 0.1 * jax.random.normal(k2, (d,), jnp.float32)
        rm = 0.1 * jax.random.normal(k3, (d,), jnp.float32)
        rv = 1.0 + jnp.abs(0.1 * jax.random.normal(k4, (d,), jnp.float32))
        s = gamma / jnp.sqrt(rv + BN_EPS)
        return s.reshape(1, d), (beta - rm * s).reshape(1, d)

    p['bn1s'], p['bn1t'] = bn_params(ks[14], hidden)
    p['bn2s'], p['bn2t'] = bn_params(ks[15], hidden)
    p['bn3s'], p['bn3t'] = bn_params(ks[16], C)
    return p


def to_kernel_params(p):
    # matmul weights go to the MXU as bf16 (f32 accumulation); everything else stays f32
    bf16_keys = ('wqkv', 'wproj', 'w1', 'w2')
    return [p[name].astype(jnp.bfloat16) if name in bf16_keys else p[name]
            for name in PARAM_ORDER]


def stack_block_params(block_params):
    # Stack every per-layer param along a leading depth axis for the depth-fused kernel.
    per_layer = [to_kernel_params(p) for p in block_params]
    return [jnp.stack([layer[i] for layer in per_layer], axis=0)
            for i in range(len(PARAM_ORDER))]


if __name__ == "__main__":
    # Small shapes consistent with the module: embed_dim = base_dim*heads != 512 => conv MLP branch.
    base_dim, heads, depth, mlp_ratio = 8, 4, 2, 4
    C = base_dim * heads          # 32
    hidden = C * mlp_ratio        # 128 (lane-dense hidden dim)
    B, hs, ws = 2, 4, 4
    N = hs * ws                   # 16 (perfect square, as the Mlp reshape requires)

    key = jax.random.PRNGKey(0)
    kx, *kb = jax.random.split(key, depth + 1)
    x = jax.random.normal(kx, (B, N, C), jnp.float32)

    block_params = [make_block_params(kb[i], C, hidden) for i in range(depth)]
    stacked_params = stack_block_params(block_params)

    out = transformer_forward(x, stacked_params, heads, hs, ws)
    out = jax.block_until_ready(out)

    ref = reference(x, block_params, heads, hs, ws)
    assert out.shape == (B, N, C)
    max_err = float(jnp.max(jnp.abs(out - ref)))
    # Non-bit-exact vs PyTorch/JAX exact path: bf16 MXU operands, approx-reciprocal softmax
    # denominator and erf, A&S erf approximation (inference-grade tolerance).
    assert bool(jnp.allclose(out, ref, atol=5e-2, rtol=5e-2)), \
        f"mismatch vs JAX reference (max abs err {max_err})"

    # TODO(synk): Dropout / DropPath are identities at inference (drop=0, drop_path=0);
    # training-mode stochastic behavior and BatchNorm running-stat updates are not modeled.
    print("KERNEL_OK")
</pallas_src>

<mosaic_0001>
module attributes {stable_mosaic.version = 11 : i64} {
  func.func @transformer_kernel(%arg0: i32, %arg1: i32, %arg2: memref<1x16x32xf32, #tpu.memory_space<vmem>>, %arg3: memref<16x16xf32, #tpu.memory_space<vmem>>, %arg4: memref<1x1x32xf32, #tpu.memory_space<vmem>>, %arg5: memref<1x1x32xf32, #tpu.memory_space<vmem>>, %arg6: memref<1x32x96xbf16, #tpu.memory_space<vmem>>, %arg7: memref<1x1x96xf32, #tpu.memory_space<vmem>>, %arg8: memref<1x32x32xbf16, #tpu.memory_space<vmem>>, %arg9: memref<1x1x32xf32, #tpu.memory_space<vmem>>, %arg10: memref<1x1x32xf32, #tpu.memory_space<vmem>>, %arg11: memref<1x1x32xf32, #tpu.memory_space<vmem>>, %arg12: memref<1x32x128xbf16, #tpu.memory_space<vmem>>, %arg13: memref<1x1x128xf32, #tpu.memory_space<vmem>>, %arg14: memref<1x1x128xf32, #tpu.memory_space<vmem>>, %arg15: memref<1x1x128xf32, #tpu.memory_space<vmem>>, %arg16: memref<1x9x128xf32, #tpu.memory_space<vmem>>, %arg17: memref<1x1x128xf32, #tpu.memory_space<vmem>>, %arg18: memref<1x1x128xf32, #tpu.memory_space<vmem>>, %arg19: memref<1x1x128xf32, #tpu.memory_space<vmem>>, %arg20: memref<1x128x32xbf16, #tpu.memory_space<vmem>>, %arg21: memref<1x1x32xf32, #tpu.memory_space<vmem>>, %arg22: memref<1x1x32xf32, #tpu.memory_space<vmem>>, %arg23: memref<1x1x32xf32, #tpu.memory_space<vmem>>, %arg24: memref<1x16x32xf32, #tpu.memory_space<vmem>>, %arg25: memref<16x32xf32, #tpu.memory_space<vmem>>, %arg26: memref<1x6x6x128xf32, #tpu.memory_space<vmem>>) attributes {dimension_semantics = [#tpu.dimension_semantics<parallel>, #tpu.dimension_semantics<arbitrary>], iteration_bounds = array<i64: 2, 2>, scalar_prefetch = 0 : i64, scratch_operands = 2 : i64, tpu.core_type = #tpu.core_type<tc>, window_params = [{transform_indices = @transform_0, window_bounds = array<i64: 1, 16, 32>}, {pipeline_mode = #tpu.pipeline_mode<synchronous>, transform_indices = @transform_1, window_bounds = array<i64: 16, 16>}, {transform_indices = @transform_2, window_bounds = array<i64: 1, 1, 32>}, {transform_indices = @transform_3, window_bounds = array<i64: 1, 1, 32>}, {transform_indices = @transform_4, window_bounds = array<i64: 1, 32, 96>}, {transform_indices = @transform_5, window_bounds = array<i64: 1, 1, 96>}, {transform_indices = @transform_6, window_bounds = array<i64: 1, 32, 32>}, {transform_indices = @transform_7, window_bounds = array<i64: 1, 1, 32>}, {transform_indices = @transform_8, window_bounds = array<i64: 1, 1, 32>}, {transform_indices = @transform_9, window_bounds = array<i64: 1, 1, 32>}, {transform_indices = @transform_10, window_bounds = array<i64: 1, 32, 128>}, {transform_indices = @transform_11, window_bounds = array<i64: 1, 1, 128>}, {transform_indices = @transform_12, window_bounds = array<i64: 1, 1, 128>}, {transform_indices = @transform_13, window_bounds = array<i64: 1, 1, 128>}, {transform_indices = @transform_14, window_bounds = array<i64: 1, 9, 128>}, {transform_indices = @transform_15, window_bounds = array<i64: 1, 1, 128>}, {transform_indices = @transform_16, window_bounds = array<i64: 1, 1, 128>}, {transform_indices = @transform_17, window_bounds = array<i64: 1, 1, 128>}, {transform_indices = @transform_18, window_bounds = array<i64: 1, 128, 32>}, {transform_indices = @transform_19, window_bounds = array<i64: 1, 1, 32>}, {transform_indices = @transform_20, window_bounds = array<i64: 1, 1, 32>}, {transform_indices = @transform_21, window_bounds = array<i64: 1, 1, 32>}, {transform_indices = @transform_22, window_bounds = array<i64: 1, 16, 32>}]} {
    %c0_i32 = arith.constant 0 : i32
    %0 = arith.cmpi eq, %arg1, %c0_i32 : i32
    %1 = arith.extui %0 : i1 to i32
    %c0_i32_0 = arith.constant 0 : i32
    %2 = arith.cmpi ne, %1, %c0_i32_0 : i32
    scf.if %2 {
      %c0_166 = arith.constant 0 : index
      %c0_167 = arith.constant 0 : index
      %c0_168 = arith.constant 0 : index
      %345 = vector.load %arg2[%c0_166, %c0_167, %c0_168] : memref<1x16x32xf32, #tpu.memory_space<vmem>>, vector<1x16x32xf32>
      %346 = vector.shape_cast %345 : vector<1x16x32xf32> to vector<16x32xf32>
      %c0_169 = arith.constant 0 : index
      %c0_170 = arith.constant 0 : index
      %347 = vector.load %arg25[%c0_169, %c0_170] : memref<16x32xf32, #tpu.memory_space<vmem>>, vector<16x32xf32>
      tpu.vector_store %arg25[%c0_169, %c0_170], %346 {strides = array<i32>} : memref<16x32xf32, #tpu.memory_space<vmem>>, vector<16x32xf32>,
      %cst_171 = arith.constant 0.000000e+00 : f32
      %348 = vector.broadcast %cst_171 : f32 to vector<1x6x6x128xf32>
      %c0_172 = arith.constant 0 : index
      %c0_173 = arith.constant 0 : index
      %c0_174 = arith.constant 0 : index
      %c0_175 = arith.constant 0 : index
      %349 = vector.load %arg26[%c0_172, %c0_173, %c0_174, %c0_175] : memref<1x6x6x128xf32, #tpu.memory_space<vmem>>, vector<1x6x6x128xf32>
      tpu.vector_store %arg26[%c0_172, %c0_173, %c0_174, %c0_175], %348 {strides = array<i32>} : memref<1x6x6x128xf32, #tpu.memory_space<vmem>>, vector<1x6x6x128xf32>,
    } else {
    }
    %c0 = arith.constant 0 : index
    %c0_1 = arith.constant 0 : index
    %3 = vector.load %arg25[%c0, %c0_1] : memref<16x32xf32, #tpu.memory_space<vmem>>, vector<16x32xf32>
    %c0_2 = arith.constant 0 : index
    %c0_3 = arith.constant 0 : index
    %c0_4 = arith.constant 0 : index
    %4 = vector.load %arg4[%c0_2, %c0_3, %c0_4] : memref<1x1x32xf32, #tpu.memory_space<vmem>>, vector<1x1x32xf32>
    %5 = vector.shape_cast %4 : vector<1x1x32xf32> to vector<1x32xf32>
    %c0_5 = arith.constant 0 : index
    %c0_6 = arith.constant 0 : index
    %c0_7 = arith.constant 0 : index
    %6 = vector.load %arg5[%c0_5, %c0_6, %c0_7] : memref<1x1x32xf32, #tpu.memory_space<vmem>>, vector<1x1x32xf32>
    %7 = vector.shape_cast %6 : vector<1x1x32xf32> to vector<1x32xf32>
    %cst = arith.constant dense<0.000000e+00> : vector<16xf32>
    %8 = vector.multi_reduction <add>, %3, %cst [1] : vector<16x32xf32> to vector<16xf32>
    %9 = vector.shape_cast %8 : vector<16xf32> to vector<16x1xf32>
    %cst_8 = arith.constant 3.200000e+01 : f32
    %10 = vector.broadcast %cst_8 : f32 to vector<16x1xf32>
    %11 = arith.divf %9, %10 : vector<16x1xf32>
    %12 = vector.broadcast %11 : vector<16x1xf32> to vector<16x32xf32>
    %13 = arith.subf %3, %12 : vector<16x32xf32>
    %14 = arith.mulf %13, %13 : vector<16x32xf32>
    %cst_9 = arith.constant dense<0.000000e+00> : vector<16xf32>
    %15 = vector.multi_reduction <add>, %14, %cst_9 [1] : vector<16x32xf32> to vector<16xf32>
    %16 = vector.shape_cast %15 : vector<16xf32> to vector<16x1xf32>
    %cst_10 = arith.constant 3.200000e+01 : f32
    %17 = vector.broadcast %cst_10 : f32 to vector<16x1xf32>
    %18 = arith.divf %16, %17 : vector<16x1xf32>
    %19 = vector.broadcast %11 : vector<16x1xf32> to vector<16x32xf32>
    %20 = arith.subf %3, %19 : vector<16x32xf32>
    %cst_11 = arith.constant 9.99999997E-7 : f32
    %21 = vector.broadcast %cst_11 : f32 to vector<16x1xf32>
    %22 = arith.addf %18, %21 : vector<16x1xf32>
    %23 = math.rsqrt %22 : vector<16x1xf32>
    %24 = vector.broadcast %23 : vector<16x1xf32> to vector<16x32xf32>
    %25 = arith.mulf %20, %24 : vector<16x32xf32>
    %26 = vector.broadcast %5 : vector<1x32xf32> to vector<16x32xf32>
    %27 = arith.mulf %25, %26 : vector<16x32xf32>
    %28 = vector.broadcast %7 : vector<1x32xf32> to vector<16x32xf32>
    %29 = arith.addf %27, %28 : vector<16x32xf32>
    %30 = arith.truncf %29 : vector<16x32xf32> to vector<16x32xbf16>
    %c0_12 = arith.constant 0 : index
    %c0_13 = arith.constant 0 : index
    %c0_14 = arith.constant 0 : index
    %31 = vector.load %arg6[%c0_12, %c0_13, %c0_14] : memref<1x32x96xbf16, #tpu.memory_space<vmem>>, vector<1x32x96xbf16>
    %32 = vector.shape_cast %31 : vector<1x32x96xbf16> to vector<32x96xbf16>
    %cst_15 = arith.constant dense<0.000000e+00> : vector<16x96xf32>
    %33 = tpu.matmul %30, %32, %cst_15 {dimension_numbers = #tpu.dot_dimension_numbers<[1], [0], [0], [1], [0, 0, 1, 1], [], []>} : vector<16x32xbf16>, vector<32x96xbf16>, vector<16x96xf32> -> vector<16x96xf32>
    %c0_16 = arith.constant 0 : index
    %c0_17 = arith.constant 0 : index
    %c0_18 = arith.constant 0 : index
    %34 = vector.load %arg7[%c0_16, %c0_17, %c0_18] : memref<1x1x96xf32, #tpu.memory_space<vmem>>, vector<1x1x96xf32>
    %35 = vector.shape_cast %34 : vector<1x1x96xf32> to vector<1x96xf32>
    %36 = vector.broadcast %35 : vector<1x96xf32> to vector<16x96xf32>
    %37 = arith.addf %33, %36 : vector<16x96xf32>
    %38 = vector.extract_strided_slice %37 {offsets = [0, 0], sizes = [16, 8], strides = [1, 1]} : vector<16x96xf32> to vector<16x8xf32>
    %39 = arith.truncf %38 : vector<16x8xf32> to vector<16x8xbf16>
    %40 = vector.extract_strided_slice %37 {offsets = [0, 32], sizes = [16, 8], strides = [1, 1]} : vector<16x96xf32> to vector<16x8xf32>
    %41 = arith.truncf %40 : vector<16x8xf32> to vector<16x8xbf16>
    %42 = vector.extract_strided_slice %37 {offsets = [0, 64], sizes = [16, 8], strides = [1, 1]} : vector<16x96xf32> to vector<16x8xf32>
    %43 = arith.truncf %42 : vector<16x8xf32> to vector<16x8xbf16>
    %cst_19 = arith.constant dense<0.000000e+00> : vector<16x16xf32>
    %44 = tpu.matmul %39, %41, %cst_19 {dimension_numbers = #tpu.dot_dimension_numbers<[1], [1], [0], [0], [0, 0, 1, 0], [], []>} : vector<16x8xbf16>, vector<16x8xbf16>, vector<16x16xf32> -> vector<16x16xf32>
    %cst_20 = arith.constant 0.353553385 : f32
    %45 = vector.broadcast %cst_20 : f32 to vector<16x16xf32>
    %46 = arith.mulf %44, %45 : vector<16x16xf32>
    %cst_21 = arith.constant dense<0xFF800000> : vector<16xf32>
    %47 = vector.multi_reduction <maximumf>, %46, %cst_21 [1] : vector<16x16xf32> to vector<16xf32>
    %48 = vector.shape_cast %47 : vector<16xf32> to vector<16x1xf32>
    %49 = vector.broadcast %48 : vector<16x1xf32> to vector<16x16xf32>
    %50 = arith.subf %46, %49 : vector<16x16xf32>
    %51 = math.exp %50 : vector<16x16xf32>
    %cst_22 = arith.constant dense<0.000000e+00> : vector<16xf32>
    %52 = vector.multi_reduction <add>, %51, %cst_22 [1] : vector<16x16xf32> to vector<16xf32>
    %53 = vector.shape_cast %52 : vector<16xf32> to vector<16x1xf32>
    %54 = tpu.reciprocal %53 {approx = true} : vector<16x1xf32> -> vector<16x1xf32>
    %55 = vector.broadcast %54 : vector<16x1xf32> to vector<16x16xf32>
    %56 = arith.mulf %51, %55 : vector<16x16xf32>
    %57 = arith.truncf %56 : vector<16x16xf32> to vector<16x16xbf16>
    %cst_23 = arith.constant dense<0.000000e+00> : vector<16x8xf32>
    %58 = tpu.matmul %57, %43, %cst_23 {dimension_numbers = #tpu.dot_dimension_numbers<[1], [0], [0], [1], [0, 0, 1, 1], [], []>} : vector<16x16xbf16>, vector<16x8xbf16>, vector<16x8xf32> -> vector<16x8xf32>
    %59 = vector.extract_strided_slice %37 {offsets = [0, 8], sizes = [16, 8], strides = [1, 1]} : vector<16x96xf32> to vector<16x8xf32>
    %60 = arith.truncf %59 : vector<16x8xf32> to vector<16x8xbf16>
    %61 = vector.extract_strided_slice %37 {offsets = [0, 40], sizes = [16, 8], strides = [1, 1]} : vector<16x96xf32> to vector<16x8xf32>
    %62 = arith.truncf %61 : vector<16x8xf32> to vector<16x8xbf16>
    %63 = vector.extract_strided_slice %37 {offsets = [0, 72], sizes = [16, 8], strides = [1, 1]} : vector<16x96xf32> to vector<16x8xf32>
    %64 = arith.truncf %63 : vector<16x8xf32> to vector<16x8xbf16>
    %cst_24 = arith.constant dense<0.000000e+00> : vector<16x16xf32>
    %65 = tpu.matmul %60, %62, %cst_24 {dimension_numbers = #tpu.dot_dimension_numbers<[1], [1], [0], [0], [0, 0, 1, 0], [], []>} : vector<16x8xbf16>, vector<16x8xbf16>, vector<16x16xf32> -> vector<16x16xf32>
    %cst_25 = arith.constant 0.353553385 : f32
    %66 = vector.broadcast %cst_25 : f32 to vector<16x16xf32>
    %67 = arith.mulf %65, %66 : vector<16x16xf32>
    %cst_26 = arith.constant dense<0xFF800000> : vector<16xf32>
    %68 = vector.multi_reduction <maximumf>, %67, %cst_26 [1] : vector<16x16xf32> to vector<16xf32>
    %69 = vector.shape_cast %68 : vector<16xf32> to vector<16x1xf32>
    %70 = vector.broadcast %69 : vector<16x1xf32> to vector<16x16xf32>
    %71 = arith.subf %67, %70 : vector<16x16xf32>
    %72 = math.exp %71 : vector<16x16xf32>
    %cst_27 = arith.constant dense<0.000000e+00> : vector<16xf32>
    %73 = vector.multi_reduction <add>, %72, %cst_27 [1] : vector<16x16xf32> to vector<16xf32>
    %74 = vector.shape_cast %73 : vector<16xf32> to vector<16x1xf32>
    %75 = tpu.reciprocal %74 {approx = true} : vector<16x1xf32> -> vector<16x1xf32>
    %76 = vector.broadcast %75 : vector<16x1xf32> to vector<16x16xf32>
    %77 = arith.mulf %72, %76 : vector<16x16xf32>
    %78 = arith.truncf %77 : vector<16x16xf32> to vector<16x16xbf16>
    %cst_28 = arith.constant dense<0.000000e+00> : vector<16x8xf32>
    %79 = tpu.matmul %78, %64, %cst_28 {dimension_numbers = #tpu.dot_dimension_numbers<[1], [0], [0], [1], [0, 0, 1, 1], [], []>} : vector<16x16xbf16>, vector<16x8xbf16>, vector<16x8xf32> -> vector<16x8xf32>
    %80 = vector.extract_strided_slice %37 {offsets = [0, 16], sizes = [16, 8], strides = [1, 1]} : vector<16x96xf32> to vector<16x8xf32>
    %81 = arith.truncf %80 : vector<16x8xf32> to vector<16x8xbf16>
    %82 = vector.extract_strided_slice %37 {offsets = [0, 48], sizes = [16, 8], strides = [1, 1]} : vector<16x96xf32> to vector<16x8xf32>
    %83 = arith.truncf %82 : vector<16x8xf32> to vector<16x8xbf16>
    %84 = vector.extract_strided_slice %37 {offsets = [0, 80], sizes = [16, 8], strides = [1, 1]} : vector<16x96xf32> to vector<16x8xf32>
    %85 = arith.truncf %84 : vector<16x8xf32> to vector<16x8xbf16>
    %cst_29 = arith.constant dense<0.000000e+00> : vector<16x16xf32>
    %86 = tpu.matmul %81, %83, %cst_29 {dimension_numbers = #tpu.dot_dimension_numbers<[1], [1], [0], [0], [0, 0, 1, 0], [], []>} : vector<16x8xbf16>, vector<16x8xbf16>, vector<16x16xf32> -> vector<16x16xf32>
    %cst_30 = arith.constant 0.353553385 : f32
    %87 = vector.broadcast %cst_30 : f32 to vector<16x16xf32>
    %88 = arith.mulf %86, %87 : vector<16x16xf32>
    %cst_31 = arith.constant dense<0xFF800000> : vector<16xf32>
    %89 = vector.multi_reduction <maximumf>, %88, %cst_31 [1] : vector<16x16xf32> to vector<16xf32>
    %90 = vector.shape_cast %89 : vector<16xf32> to vector<16x1xf32>
    %91 = vector.broadcast %90 : vector<16x1xf32> to vector<16x16xf32>
    %92 = arith.subf %88, %91 : vector<16x16xf32>
    %93 = math.exp %92 : vector<16x16xf32>
    %cst_32 = arith.constant dense<0.000000e+00> : vector<16xf32>
    %94 = vector.multi_reduction <add>, %93, %cst_32 [1] : vector<16x16xf32> to vector<16xf32>
    %95 = vector.shape_cast %94 : vector<16xf32> to vector<16x1xf32>
    %96 = tpu.reciprocal %95 {approx = true} : vector<16x1xf32> -> vector<16x1xf32>
    %97 = vector.broadcast %96 : vector<16x1xf32> to vector<16x16xf32>
    %98 = arith.mulf %93, %97 : vector<16x16xf32>
    %99 = arith.truncf %98 : vector<16x16xf32> to vector<16x16xbf16>
    %cst_33 = arith.constant dense<0.000000e+00> : vector<16x8xf32>
    %100 = tpu.matmul %99, %85, %cst_33 {dimension_numbers = #tpu.dot_dimension_numbers<[1], [0], [0], [1], [0, 0, 1, 1], [], []>} : vector<16x16xbf16>, vector<16x8xbf16>, vector<16x8xf32> -> vector<16x8xf32>
    %101 = vector.extract_strided_slice %37 {offsets = [0, 24], sizes = [16, 8], strides = [1, 1]} : vector<16x96xf32> to vector<16x8xf32>
    %102 = arith.truncf %101 : vector<16x8xf32> to vector<16x8xbf16>
    %103 = vector.extract_strided_slice %37 {offsets = [0, 56], sizes = [16, 8], strides = [1, 1]} : vector<16x96xf32> to vector<16x8xf32>
    %104 = arith.truncf %103 : vector<16x8xf32> to vector<16x8xbf16>
    %105 = vector.extract_strided_slice %37 {offsets = [0, 88], sizes = [16, 8], strides = [1, 1]} : vector<16x96xf32> to vector<16x8xf32>
    %106 = arith.truncf %105 : vector<16x8xf32> to vector<16x8xbf16>
    %cst_34 = arith.constant dense<0.000000e+00> : vector<16x16xf32>
    %107 = tpu.matmul %102, %104, %cst_34 {dimension_numbers = #tpu.dot_dimension_numbers<[1], [1], [0], [0], [0, 0, 1, 0], [], []>} : vector<16x8xbf16>, vector<16x8xbf16>, vector<16x16xf32> -> vector<16x16xf32>
    %cst_35 = arith.constant 0.353553385 : f32
    %108 = vector.broadcast %cst_35 : f32 to vector<16x16xf32>
    %109 = arith.mulf %107, %108 : vector<16x16xf32>
    %cst_36 = arith.constant dense<0xFF800000> : vector<16xf32>
    %110 = vector.multi_reduction <maximumf>, %109, %cst_36 [1] : vector<16x16xf32> to vector<16xf32>
    %111 = vector.shape_cast %110 : vector<16xf32> to vector<16x1xf32>
    %112 = vector.broadcast %111 : vector<16x1xf32> to vector<16x16xf32>
    %113 = arith.subf %109, %112 : vector<16x16xf32>
    %114 = math.exp %113 : vector<16x16xf32>
    %cst_37 = arith.constant dense<0.000000e+00> : vector<16xf32>
    %115 = vector.multi_reduction <add>, %114, %cst_37 [1] : vector<16x16xf32> to vector<16xf32>
    %116 = vector.shape_cast %115 : vector<16xf32> to vector<16x1xf32>
    %117 = tpu.reciprocal %116 {approx = true} : vector<16x1xf32> -> vector<16x1xf32>
    %118 = vector.broadcast %117 : vector<16x1xf32> to vector<16x16xf32>
    %119 = arith.mulf %114, %118 : vector<16x16xf32>
    %120 = arith.truncf %119 : vector<16x16xf32> to vector<16x16xbf16>
    %cst_38 = arith.constant dense<0.000000e+00> : vector<16x8xf32>
    %121 = tpu.matmul %120, %106, %cst_38 {dimension_numbers = #tpu.dot_dimension_numbers<[1], [0], [0], [1], [0, 0, 1, 1], [], []>} : vector<16x16xbf16>, vector<16x8xbf16>, vector<16x8xf32> -> vector<16x8xf32>
    %122 = tpu.concatenate %58, %79, %100, %121 in 1 : vector<16x8xf32>, vector<16x8xf32>, vector<16x8xf32>, vector<16x8xf32> -> vector<16x32xf32>
    %123 = arith.truncf %122 : vector<16x32xf32> to vector<16x32xbf16>
    %c0_39 = arith.constant 0 : index
    %c0_40 = arith.constant 0 : index
    %c0_41 = arith.constant 0 : index
    %124 = vector.load %arg8[%c0_39, %c0_40, %c0_41] : memref<1x32x32xbf16, #tpu.memory_space<vmem>>, vector<1x32x32xbf16>
    %125 = vector.shape_cast %124 : vector<1x32x32xbf16> to vector<32x32xbf16>
    %cst_42 = arith.constant dense<0.000000e+00> : vector<16x32xf32>
    %126 = tpu.matmul %123, %125, %cst_42 {dimension_numbers = #tpu.dot_dimension_numbers<[1], [0], [0], [1], [0, 0, 1, 1], [], []>} : vector<16x32xbf16>, vector<32x32xbf16>, vector<16x32xf32> -> vector<16x32xf32>
    %c0_43 = arith.constant 0 : index
    %c0_44 = arith.constant 0 : index
    %c0_45 = arith.constant 0 : index
    %127 = vector.load %arg9[%c0_43, %c0_44, %c0_45] : memref<1x1x32xf32, #tpu.memory_space<vmem>>, vector<1x1x32xf32>
    %128 = vector.shape_cast %127 : vector<1x1x32xf32> to vector<1x32xf32>
    %129 = vector.broadcast %128 : vector<1x32xf32> to vector<16x32xf32>
    %130 = arith.addf %126, %129 : vector<16x32xf32>
    %131 = arith.addf %3, %130 : vector<16x32xf32>
    %c0_46 = arith.constant 0 : index
    %c0_47 = arith.constant 0 : index
    %c0_48 = arith.constant 0 : index
    %132 = vector.load %arg10[%c0_46, %c0_47, %c0_48] : memref<1x1x32xf32, #tpu.memory_space<vmem>>, vector<1x1x32xf32>
    %133 = vector.shape_cast %132 : vector<1x1x32xf32> to vector<1x32xf32>
    %c0_49 = arith.constant 0 : index
    %c0_50 = arith.constant 0 : index
    %c0_51 = arith.constant 0 : index
    %134 = vector.load %arg11[%c0_49, %c0_50, %c0_51] : memref<1x1x32xf32, #tpu.memory_space<vmem>>, vector<1x1x32xf32>
    %135 = vector.shape_cast %134 : vector<1x1x32xf32> to vector<1x32xf32>
    %cst_52 = arith.constant dense<0.000000e+00> : vector<16xf32>
    %136 = vector.multi_reduction <add>, %131, %cst_52 [1] : vector<16x32xf32> to vector<16xf32>
    %137 = vector.shape_cast %136 : vector<16xf32> to vector<16x1xf32>
    %cst_53 = arith.constant 3.200000e+01 : f32
    %138 = vector.broadcast %cst_53 : f32 to vector<16x1xf32>
    %139 = arith.divf %137, %138 : vector<16x1xf32>
    %140 = vector.broadcast %139 : vector<16x1xf32> to vector<16x32xf32>
    %141 = arith.subf %131, %140 : vector<16x32xf32>
    %142 = arith.mulf %141, %141 : vector<16x32xf32>
    %cst_54 = arith.constant dense<0.000000e+00> : vector<16xf32>
    %143 = vector.multi_reduction <add>, %142, %cst_54 [1] : vector<16x32xf32> to vector<16xf32>
    %144 = vector.shape_cast %143 : vector<16xf32> to vector<16x1xf32>
    %cst_55 = arith.constant 3.200000e+01 : f32
    %145 = vector.broadcast %cst_55 : f32 to vector<16x1xf32>
    %146 = arith.divf %144, %145 : vector<16x1xf32>
    %147 = vector.broadcast %139 : vector<16x1xf32> to vector<16x32xf32>
    %148 = arith.subf %131, %147 : vector<16x32xf32>
    %cst_56 = arith.constant 9.99999997E-7 : f32
    %149 = vector.broadcast %cst_56 : f32 to vector<16x1xf32>
    %150 = arith.addf %146, %149 : vector<16x1xf32>
    %151 = math.rsqrt %150 : vector<16x1xf32>
    %152 = vector.broadcast %151 : vector<16x1xf32> to vector<16x32xf32>
    %153 = arith.mulf %148, %152 : vector<16x32xf32>
    %154 = vector.broadcast %133 : vector<1x32xf32> to vector<16x32xf32>
    %155 = arith.mulf %153, %154 : vector<16x32xf32>
    %156 = vector.broadcast %135 : vector<1x32xf32> to vector<16x32xf32>
    %157 = arith.addf %155, %156 : vector<16x32xf32>
    %158 = arith.truncf %157 : vector<16x32xf32> to vector<16x32xbf16>
    %c0_57 = arith.constant 0 : index
    %c0_58 = arith.constant 0 : index
    %c0_59 = arith.constant 0 : index
    %159 = vector.load %arg12[%c0_57, %c0_58, %c0_59] : memref<1x32x128xbf16, #tpu.memory_space<vmem>>, vector<1x32x128xbf16>
    %160 = vector.shape_cast %159 : vector<1x32x128xbf16> to vector<32x128xbf16>
    %cst_60 = arith.constant dense<0.000000e+00> : vector<16x128xf32>
    %161 = tpu.matmul %158, %160, %cst_60 {dimension_numbers = #tpu.dot_dimension_numbers<[1], [0], [0], [1], [0, 0, 1, 1], [], []>} : vector<16x32xbf16>, vector<32x128xbf16>, vector<16x128xf32> -> vector<16x128xf32>
    %c0_61 = arith.constant 0 : index
    %c0_62 = arith.constant 0 : index
    %c0_63 = arith.constant 0 : index
    %162 = vector.load %arg13[%c0_61, %c0_62, %c0_63] : memref<1x1x128xf32, #tpu.memory_space<vmem>>, vector<1x1x128xf32>
    %163 = vector.shape_cast %162 : vector<1x1x128xf32> to vector<1x128xf32>
    %164 = vector.broadcast %163 : vector<1x128xf32> to vector<16x128xf32>
    %165 = arith.addf %161, %164 : vector<16x128xf32>
    %c0_64 = arith.constant 0 : index
    %c0_65 = arith.constant 0 : index
    %c0_66 = arith.constant 0 : index
    %166 = vector.load %arg14[%c0_64, %c0_65, %c0_66] : memref<1x1x128xf32, #tpu.memory_space<vmem>>, vector<1x1x128xf32>
    %167 = vector.shape_cast %166 : vector<1x1x128xf32> to vector<1x128xf32>
    %168 = vector.broadcast %167 : vector<1x128xf32> to vector<16x128xf32>
    %169 = arith.mulf %165, %168 : vector<16x128xf32>
    %c0_67 = arith.constant 0 : index
    %c0_68 = arith.constant 0 : index
    %c0_69 = arith.constant 0 : index
    %170 = vector.load %arg15[%c0_67, %c0_68, %c0_69] : memref<1x1x128xf32, #tpu.memory_space<vmem>>, vector<1x1x128xf32>
    %171 = vector.shape_cast %170 : vector<1x1x128xf32> to vector<1x128xf32>
    %172 = vector.broadcast %171 : vector<1x128xf32> to vector<16x128xf32>
    %173 = arith.addf %169, %172 : vector<16x128xf32>
    %cst_70 = arith.constant 5.000000e-01 : f32
    %174 = vector.broadcast %cst_70 : f32 to vector<16x128xf32>
    %175 = arith.mulf %174, %173 : vector<16x128xf32>
    %cst_71 = arith.constant 0.707106769 : f32
    %176 = vector.broadcast %cst_71 : f32 to vector<16x128xf32>
    %177 = arith.mulf %173, %176 : vector<16x128xf32>
    %cst_72 = arith.constant 0.000000e+00 : f32
    %178 = vector.broadcast %cst_72 : f32 to vector<16x128xf32>
    %179 = arith.cmpf oge, %177, %178 : vector<16x128xf32>
    %cst_73 = arith.constant 1.000000e+00 : f32
    %cst_74 = arith.constant -1.000000e+00 : f32
    %180 = vector.broadcast %cst_73 : f32 to vector<16x128xf32>
    %181 = vector.broadcast %cst_74 : f32 to vector<16x128xf32>
    %182 = arith.select %179, %180, %181 : vector<16x128xi1>, vector<16x128xf32>
    %183 = math.absf %177 : vector<16x128xf32>
    %cst_75 = arith.constant 0.327591091 : f32
    %184 = vector.broadcast %cst_75 : f32 to vector<16x128xf32>
    %185 = arith.mulf %184, %183 : vector<16x128xf32>
    %cst_76 = arith.constant 1.000000e+00 : f32
    %186 = vector.broadcast %cst_76 : f32 to vector<16x128xf32>
    %187 = arith.addf %186, %185 : vector<16x128xf32>
    %188 = tpu.reciprocal %187 {approx = true} : vector<16x128xf32> -> vector<16x128xf32>
    %cst_77 = arith.constant 1.06140542 : f32
    %189 = vector.broadcast %cst_77 : f32 to vector<16x128xf32>
    %190 = arith.mulf %189, %188 : vector<16x128xf32>
    %cst_78 = arith.constant -1.45315206 : f32
    %191 = vector.broadcast %cst_78 : f32 to vector<16x128xf32>
    %192 = arith.addf %190, %191 : vector<16x128xf32>
    %193 = arith.mulf %192, %188 : vector<16x128xf32>
    %cst_79 = arith.constant 1.42141378 : f32
    %194 = vector.broadcast %cst_79 : f32 to vector<16x128xf32>
    %195 = arith.addf %193, %194 : vector<16x128xf32>
    %196 = arith.mulf %195, %188 : vector<16x128xf32>
    %cst_80 = arith.constant -0.284496725 : f32
    %197 = vector.broadcast %cst_80 : f32 to vector<16x128xf32>
    %198 = arith.addf %196, %197 : vector<16x128xf32>
    %199 = arith.mulf %198, %188 : vector<16x128xf32>
    %cst_81 = arith.constant 0.254829586 : f32
    %200 = vector.broadcast %cst_81 : f32 to vector<16x128xf32>
    %201 = arith.addf %199, %200 : vector<16x128xf32>
    %202 = arith.mulf %201, %188 : vector<16x128xf32>
    %cst_82 = arith.constant 0.000000e+00 : f32
    %203 = vector.broadcast %cst_82 : f32 to vector<16x128xf32>
    %204 = arith.subf %203, %183 : vector<16x128xf32>
    %205 = arith.mulf %204, %183 : vector<16x128xf32>
    %206 = math.exp %205 : vector<16x128xf32>
    %207 = arith.mulf %202, %206 : vector<16x128xf32>
    %cst_83 = arith.constant 1.000000e+00 : f32
    %208 = vector.broadcast %cst_83 : f32 to vector<16x128xf32>
    %209 = arith.subf %208, %207 : vector<16x128xf32>
    %210 = arith.mulf %182, %209 : vector<16x128xf32>
    %cst_84 = arith.constant 1.000000e+00 : f32
    %211 = vector.broadcast %cst_84 : f32 to vector<16x128xf32>
    %212 = arith.addf %211, %210 : vector<16x128xf32>
    %213 = arith.mulf %175, %212 : vector<16x128xf32>
    %214 = vector.shape_cast %213 : vector<16x128xf32> to vector<1x4x4x128xf32>
    %c0_85 = arith.constant 0 : index
    %c1 = arith.constant 1 : index
    %c1_86 = arith.constant 1 : index
    %c0_87 = arith.constant 0 : index
    %215 = vector.load %arg26[%c0_85, %c1, %c1_86, %c0_87] : memref<1x6x6x128xf32, #tpu.memory_space<vmem>>, vector<1x4x4x128xf32>
    tpu.vector_store %arg26[%c0_85, %c1, %c1_86, %c0_87], %214 {strides = array<i32>} : memref<1x6x6x128xf32, #tpu.memory_space<vmem>>, vector<1x4x4x128xf32>,
    %c0_88 = arith.constant 0 : index
    %c0_89 = arith.constant 0 : index
    %c0_90 = arith.constant 0 : index
    %216 = vector.load %arg16[%c0_88, %c0_89, %c0_90] : memref<1x9x128xf32, #tpu.memory_space<vmem>>, vector<1x9x128xf32>
    %217 = vector.shape_cast %216 : vector<1x9x128xf32> to vector<9x128xf32>
    %c0_91 = arith.constant 0 : index
    %c0_92 = arith.constant 0 : index
    %c0_93 = arith.constant 0 : index
    %c0_94 = arith.constant 0 : index
    %218 = vector.load %arg26[%c0_91, %c0_92, %c0_93, %c0_94] : memref<1x6x6x128xf32, #tpu.memory_space<vmem>>, vector<1x4x4x128xf32>
    %219 = vector.extract_strided_slice %217 {offsets = [0, 0], sizes = [1, 128], strides = [1, 1]} : vector<9x128xf32> to vector<1x128xf32>
    %220 = vector.shape_cast %219 : vector<1x128xf32> to vector<1x1x1x128xf32>
    %221 = vector.broadcast %220 : vector<1x1x1x128xf32> to vector<1x4x4x128xf32>
    %222 = arith.mulf %218, %221 : vector<1x4x4x128xf32>
    %c0_95 = arith.constant 0 : index
    %c0_96 = arith.constant 0 : index
    %c1_97 = arith.constant 1 : index
    %c0_98 = arith.constant 0 : index
    %223 = vector.load %arg26[%c0_95, %c0_96, %c1_97, %c0_98] : memref<1x6x6x128xf32, #tpu.memory_space<vmem>>, vector<1x4x4x128xf32>
    %224 = vector.extract_strided_slice %217 {offsets = [1, 0], sizes = [1, 128], strides = [1, 1]} : vector<9x128xf32> to vector<1x128xf32>
    %225 = vector.shape_cast %224 : vector<1x128xf32> to vector<1x1x1x128xf32>
    %226 = vector.broadcast %225 : vector<1x1x1x128xf32> to vector<1x4x4x128xf32>
    %227 = arith.mulf %223, %226 : vector<1x4x4x128xf32>
    %228 = arith.addf %222, %227 : vector<1x4x4x128xf32>
    %c0_99 = arith.constant 0 : index
    %c0_100 = arith.constant 0 : index
    %c2 = arith.constant 2 : index
    %c0_101 = arith.constant 0 : index
    %229 = vector.load %arg26[%c0_99, %c0_100, %c2, %c0_101] : memref<1x6x6x128xf32, #tpu.memory_space<vmem>>, vector<1x4x4x128xf32>
    %230 = vector.extract_strided_slice %217 {offsets = [2, 0], sizes = [1, 128], strides = [1, 1]} : vector<9x128xf32> to vector<1x128xf32>
    %231 = vector.shape_cast %230 : vector<1x128xf32> to vector<1x1x1x128xf32>
    %232 = vector.broadcast %231 : vector<1x1x1x128xf32> to vector<1x4x4x128xf32>
    %233 = arith.mulf %229, %232 : vector<1x4x4x128xf32>
    %234 = arith.addf %228, %233 : vector<1x4x4x128xf32>
    %c0_102 = arith.constant 0 : index
    %c1_103 = arith.constant 1 : index
    %c0_104 = arith.constant 0 : index
    %c0_105 = arith.constant 0 : index
    %235 = vector.load %arg26[%c0_102, %c1_103, %c0_104, %c0_105] : memref<1x6x6x128xf32, #tpu.memory_space<vmem>>, vector<1x4x4x128xf32>
    %236 = vector.extract_strided_slice %217 {offsets = [3, 0], sizes = [1, 128], strides = [1, 1]} : vector<9x128xf32> to vector<1x128xf32>
    %237 = vector.shape_cast %236 : vector<1x128xf32> to vector<1x1x1x128xf32>
    %238 = vector.broadcast %237 : vector<1x1x1x128xf32> to vector<1x4x4x128xf32>
    %239 = arith.mulf %235, %238 : vector<1x4x4x128xf32>
    %240 = arith.addf %234, %239 : vector<1x4x4x128xf32>
    %c0_106 = arith.constant 0 : index
    %c1_107 = arith.constant 1 : index
    %c1_108 = arith.constant 1 : index
    %c0_109 = arith.constant 0 : index
    %241 = vector.load %arg26[%c0_106, %c1_107, %c1_108, %c0_109] : memref<1x6x6x128xf32, #tpu.memory_space<vmem>>, vector<1x4x4x128xf32>
    %242 = vector.extract_strided_slice %217 {offsets = [4, 0], sizes = [1, 128], strides = [1, 1]} : vector<9x128xf32> to vector<1x128xf32>
    %243 = vector.shape_cast %242 : vector<1x128xf32> to vector<1x1x1x128xf32>
    %244 = vector.broadcast %243 : vector<1x1x1x128xf32> to vector<1x4x4x128xf32>
    %245 = arith.mulf %241, %244 : vector<1x4x4x128xf32>
    %246 = arith.addf %240, %245 : vector<1x4x4x128xf32>
    %c0_110 = arith.constant 0 : index
    %c1_111 = arith.constant 1 : index
    %c2_112 = arith.constant 2 : index
    %c0_113 = arith.constant 0 : index
    %247 = vector.load %arg26[%c0_110, %c1_111, %c2_112, %c0_113] : memref<1x6x6x128xf32, #tpu.memory_space<vmem>>, vector<1x4x4x128xf32>
    %248 = vector.extract_strided_slice %217 {offsets = [5, 0], sizes = [1, 128], strides = [1, 1]} : vector<9x128xf32> to vector<1x128xf32>
    %249 = vector.shape_cast %248 : vector<1x128xf32> to vector<1x1x1x128xf32>
    %250 = vector.broadcast %249 : vector<1x1x1x128xf32> to vector<1x4x4x128xf32>
    %251 = arith.mulf %247, %250 : vector<1x4x4x128xf32>
    %252 = arith.addf %246, %251 : vector<1x4x4x128xf32>
    %c0_114 = arith.constant 0 : index
    %c2_115 = arith.constant 2 : index
    %c0_116 = arith.constant 0 : index
    %c0_117 = arith.constant 0 : index
    %253 = vector.load %arg26[%c0_114, %c2_115, %c0_116, %c0_117] : memref<1x6x6x128xf32, #tpu.memory_space<vmem>>, vector<1x4x4x128xf32>
    %254 = vector.extract_strided_slice %217 {offsets = [6, 0], sizes = [1, 128], strides = [1, 1]} : vector<9x128xf32> to vector<1x128xf32>
    %255 = vector.shape_cast %254 : vector<1x128xf32> to vector<1x1x1x128xf32>
    %256 = vector.broadcast %255 : vector<1x1x1x128xf32> to vector<1x4x4x128xf32>
    %257 = arith.mulf %253, %256 : vector<1x4x4x128xf32>
    %258 = arith.addf %252, %257 : vector<1x4x4x128xf32>
    %c0_118 = arith.constant 0 : index
    %c2_119 = arith.constant 2 : index
    %c1_120 = arith.constant 1 : index
    %c0_121 = arith.constant 0 : index
    %259 = vector.load %arg26[%c0_118, %c2_119, %c1_120, %c0_121] : memref<1x6x6x128xf32, #tpu.memory_space<vmem>>, vector<1x4x4x128xf32>
    %260 = vector.extract_strided_slice %217 {offsets = [7, 0], sizes = [1, 128], strides = [1, 1]} : vector<9x128xf32> to vector<1x128xf32>
    %261 = vector.shape_cast %260 : vector<1x128xf32> to vector<1x1x1x128xf32>
    %262 = vector.broadcast %261 : vector<1x1x1x128xf32> to vector<1x4x4x128xf32>
    %263 = arith.mulf %259, %262 : vector<1x4x4x128xf32>
    %264 = arith.addf %258, %263 : vector<1x4x4x128xf32>
    %c0_122 = arith.constant 0 : index
    %c2_123 = arith.constant 2 : index
    %c2_124 = arith.constant 2 : index
    %c0_125 = arith.constant 0 : index
    %265 = vector.load %arg26[%c0_122, %c2_123, %c2_124, %c0_125] : memref<1x6x6x128xf32, #tpu.memory_space<vmem>>, vector<1x4x4x128xf32>
    %266 = vector.extract_strided_slice %217 {offsets = [8, 0], sizes = [1, 128], strides = [1, 1]} : vector<9x128xf32> to vector<1x128xf32>
    %267 = vector.shape_cast %266 : vector<1x128xf32> to vector<1x1x1x128xf32>
    %268 = vector.broadcast %267 : vector<1x1x1x128xf32> to vector<1x4x4x128xf32>
    %269 = arith.mulf %265, %268 : vector<1x4x4x128xf32>
    %270 = arith.addf %264, %269 : vector<1x4x4x128xf32>
    %271 = vector.shape_cast %270 : vector<1x4x4x128xf32> to vector<16x128xf32>
    %c0_126 = arith.constant 0 : index
    %c0_127 = arith.constant 0 : index
    %c0_128 = arith.constant 0 : index
    %272 = vector.load %arg17[%c0_126, %c0_127, %c0_128] : memref<1x1x128xf32, #tpu.memory_space<vmem>>, vector<1x1x128xf32>
    %273 = vector.shape_cast %272 : vector<1x1x128xf32> to vector<1x128xf32>
    %274 = vector.broadcast %273 : vector<1x128xf32> to vector<16x128xf32>
    %275 = arith.addf %271, %274 : vector<16x128xf32>
    %c0_129 = arith.constant 0 : index
    %c0_130 = arith.constant 0 : index
    %c0_131 = arith.constant 0 : index
    %276 = vector.load %arg18[%c0_129, %c0_130, %c0_131] : memref<1x1x128xf32, #tpu.memory_space<vmem>>, vector<1x1x128xf32>
    %277 = vector.shape_cast %276 : vector<1x1x128xf32> to vector<1x128xf32>
    %278 = vector.broadcast %277 : vector<1x128xf32> to vector<16x128xf32>
    %279 = arith.mulf %275, %278 : vector<16x128xf32>
    %c0_132 = arith.constant 0 : index
    %c0_133 = arith.constant 0 : index
    %c0_134 = arith.constant 0 : index
    %280 = vector.load %arg19[%c0_132, %c0_133, %c0_134] : memref<1x1x128xf32, #tpu.memory_space<vmem>>, vector<1x1x128xf32>
    %281 = vector.shape_cast %280 : vector<1x1x128xf32> to vector<1x128xf32>
    %282 = vector.broadcast %281 : vector<1x128xf32> to vector<16x128xf32>
    %283 = arith.addf %279, %282 : vector<16x128xf32>
    %cst_135 = arith.constant 5.000000e-01 : f32
    %284 = vector.broadcast %cst_135 : f32 to vector<16x128xf32>
    %285 = arith.mulf %284, %283 : vector<16x128xf32>
    %cst_136 = arith.constant 0.707106769 : f32
    %286 = vector.broadcast %cst_136 : f32 to vector<16x128xf32>
    %287 = arith.mulf %283, %286 : vector<16x128xf32>
    %cst_137 = arith.constant 0.000000e+00 : f32
    %288 = vector.broadcast %cst_137 : f32 to vector<16x128xf32>
    %289 = arith.cmpf oge, %287, %288 : vector<16x128xf32>
    %cst_138 = arith.constant 1.000000e+00 : f32
    %cst_139 = arith.constant -1.000000e+00 : f32
    %290 = vector.broadcast %cst_138 : f32 to vector<16x128xf32>
    %291 = vector.broadcast %cst_139 : f32 to vector<16x128xf32>
    %292 = arith.select %289, %290, %291 : vector<16x128xi1>, vector<16x128xf32>
    %293 = math.absf %287 : vector<16x128xf32>
    %cst_140 = arith.constant 0.327591091 : f32
    %294 = vector.broadcast %cst_140 : f32 to vector<16x128xf32>
    %295 = arith.mulf %294, %293 : vector<16x128xf32>
    %cst_141 = arith.constant 1.000000e+00 : f32
    %296 = vector.broadcast %cst_141 : f32 to vector<16x128xf32>
    %297 = arith.addf %296, %295 : vector<16x128xf32>
    %298 = tpu.reciprocal %297 {approx = true} : vector<16x128xf32> -> vector<16x128xf32>
    %cst_142 = arith.constant 1.06140542 : f32
    %299 = vector.broadcast %cst_142 : f32 to vector<16x128xf32>
    %300 = arith.mulf %299, %298 : vector<16x128xf32>
    %cst_143 = arith.constant -1.45315206 : f32
    %301 = vector.broadcast %cst_143 : f32 to vector<16x128xf32>
    %302 = arith.addf %300, %301 : vector<16x128xf32>
    %303 = arith.mulf %302, %298 : vector<16x128xf32>
    %cst_144 = arith.constant 1.42141378 : f32
    %304 = vector.broadcast %cst_144 : f32 to vector<16x128xf32>
    %305 = arith.addf %303, %304 : vector<16x128xf32>
    %306 = arith.mulf %305, %298 : vector<16x128xf32>
    %cst_145 = arith.constant -0.284496725 : f32
    %307 = vector.broadcast %cst_145 : f32 to vector<16x128xf32>
    %308 = arith.addf %306, %307 : vector<16x128xf32>
    %309 = arith.mulf %308, %298 : vector<16x128xf32>
    %cst_146 = arith.constant 0.254829586 : f32
    %310 = vector.broadcast %cst_146 : f32 to vector<16x128xf32>
    %311 = arith.addf %309, %310 : vector<16x128xf32>
    %312 = arith.mulf %311, %298 : vector<16x128xf32>
    %cst_147 = arith.constant 0.000000e+00 : f32
    %313 = vector.broadcast %cst_147 : f32 to vector<16x128xf32>
    %314 = arith.subf %313, %293 : vector<16x128xf32>
    %315 = arith.mulf %314, %293 : vector<16x128xf32>
    %316 = math.exp %315 : vector<16x128xf32>
    %317 = arith.mulf %312, %316 : vector<16x128xf32>
    %cst_148 = arith.constant 1.000000e+00 : f32
    %318 = vector.broadcast %cst_148 : f32 to vector<16x128xf32>
    %319 = arith.subf %318, %317 : vector<16x128xf32>
    %320 = arith.mulf %292, %319 : vector<16x128xf32>
    %cst_149 = arith.constant 1.000000e+00 : f32
    %321 = vector.broadcast %cst_149 : f32 to vector<16x128xf32>
    %322 = arith.addf %321, %320 : vector<16x128xf32>
    %323 = arith.mulf %285, %322 : vector<16x128xf32>
    %324 = arith.truncf %323 : vector<16x128xf32> to vector<16x128xbf16>
    %c0_150 = arith.constant 0 : index
    %c0_151 = arith.constant 0 : index
    %c0_152 = arith.constant 0 : index
    %325 = vector.load %arg20[%c0_150, %c0_151, %c0_152] : memref<1x128x32xbf16, #tpu.memory_space<vmem>>, vector<1x128x32xbf16>
    %326 = vector.shape_cast %325 : vector<1x128x32xbf16> to vector<128x32xbf16>
    %cst_153 = arith.constant dense<0.000000e+00> : vector<16x32xf32>
    %327 = tpu.matmul %324, %326, %cst_153 {dimension_numbers = #tpu.dot_dimension_numbers<[1], [0], [0], [1], [0, 0, 1, 1], [], []>} : vector<16x128xbf16>, vector<128x32xbf16>, vector<16x32xf32> -> vector<16x32xf32>
    %c0_154 = arith.constant 0 : index
    %c0_155 = arith.constant 0 : index
    %c0_156 = arith.constant 0 : index
    %328 = vector.load %arg21[%c0_154, %c0_155, %c0_156] : memref<1x1x32xf32, #tpu.memory_space<vmem>>, vector<1x1x32xf32>
    %329 = vector.shape_cast %328 : vector<1x1x32xf32> to vector<1x32xf32>
    %330 = vector.broadcast %329 : vector<1x32xf32> to vector<16x32xf32>
    %331 = arith.addf %327, %330 : vector<16x32xf32>
    %c0_157 = arith.constant 0 : index
    %c0_158 = arith.constant 0 : index
    %c0_159 = arith.constant 0 : index
    %332 = vector.load %arg22[%c0_157, %c0_158, %c0_159] : memref<1x1x32xf32, #tpu.memory_space<vmem>>, vector<1x1x32xf32>
    %333 = vector.shape_cast %332 : vector<1x1x32xf32> to vector<1x32xf32>
    %334 = vector.broadcast %333 : vector<1x32xf32> to vector<16x32xf32>
    %335 = arith.mulf %331, %334 : vector<16x32xf32>
    %c0_160 = arith.constant 0 : index
    %c0_161 = arith.constant 0 : index
    %c0_162 = arith.constant 0 : index
    %336 = vector.load %arg23[%c0_160, %c0_161, %c0_162] : memref<1x1x32xf32, #tpu.memory_space<vmem>>, vector<1x1x32xf32>
    %337 = vector.shape_cast %336 : vector<1x1x32xf32> to vector<1x32xf32>
    %338 = vector.broadcast %337 : vector<1x32xf32> to vector<16x32xf32>
    %339 = arith.addf %335, %338 : vector<16x32xf32>
    %340 = arith.addf %131, %339 : vector<16x32xf32>
    %c0_163 = arith.constant 0 : index
    %c0_164 = arith.constant 0 : index
    %341 = vector.load %arg25[%c0_163, %c0_164] : memref<16x32xf32, #tpu.memory_space<vmem>>, vector<16x32xf32>
    tpu.vector_store %arg25[%c0_163, %c0_164], %340 {strides = array<i32>} : memref<16x32xf32, #tpu.memory_space<vmem>>, vector<16x32xf32>,
    %c1_i32 = arith.constant 1 : i32
    %342 = arith.cmpi eq, %arg1, %c1_i32 : i32
    %343 = arith.extui %342 : i1 to i32
    %c0_i32_165 = arith.constant 0 : i32
    %344 = arith.cmpi ne, %343, %c0_i32_165 : i32
    scf.if %344 {
      %345 = vector.shape_cast %340 : vector<16x32xf32> to vector<1x16x32xf32>
      %c0_166 = arith.constant 0 : index
      %c0_167 = arith.constant 0 : index
      %c0_168 = arith.constant 0 : index
      %346 = vector.load %arg24[%c0_166, %c0_167, %c0_168] : memref<1x16x32xf32, #tpu.memory_space<vmem>>, vector<1x16x32xf32>
      tpu.vector_store %arg24[%c0_166, %c0_167, %c0_168], %345 {strides = array<i32>} : memref<1x16x32xf32, #tpu.memory_space<vmem>>, vector<1x16x32xf32>,
    } else {
    }
    return
  }
  func.func @transform_0(%arg0: i32, %arg1: i32) -> (i32, i32, i32) {
    %c0_i32 = arith.constant 0 : i32
    %c0_i32_0 = arith.constant 0 : i32
    %c0_i32_1 = arith.constant 0 : i32
    return %arg0, %c0_i32, %c0_i32_0 : i32, i32, i32
  }
  func.func @transform_1(%arg0: i32, %arg1: i32) -> (i32, i32) {
    %c0_i32 = arith.constant 0 : i32
    %c0_i32_0 = arith.constant 0 : i32
    %c0_i32_1 = arith.constant 0 : i32
    return %c0_i32, %c0_i32_0 : i32, i32
  }
  func.func @transform_2(%arg0: i32, %arg1: i32) -> (i32, i32, i32) {
    %c0_i32 = arith.constant 0 : i32
    %c0_i32_0 = arith.constant 0 : i32
    %c0_i32_1 = arith.constant 0 : i32
    return %arg1, %c0_i32, %c0_i32_0 : i32, i32, i32
  }
  func.func @transform_3(%arg0: i32, %arg1: i32) -> (i32, i32, i32) {
    %c0_i32 = arith.constant 0 : i32
    %c0_i32_0 = arith.constant 0 : i32
    %c0_i32_1 = arith.constant 0 : i32
    return %arg1, %c0_i32, %c0_i32_0 : i32, i32, i32
  }
  func.func @transform_4(%arg0: i32, %arg1: i32) -> (i32, i32, i32) {
    %c0_i32 = arith.constant 0 : i32
    %c0_i32_0 = arith.constant 0 : i32
    %c0_i32_1 = arith.constant 0 : i32
    return %arg1, %c0_i32, %c0_i32_0 : i32, i32, i32
  }
  func.func @transform_5(%arg0: i32, %arg1: i32) -> (i32, i32, i32) {
    %c0_i32 = arith.constant 0 : i32
    %c0_i32_0 = arith.constant 0 : i32
    %c0_i32_1 = arith.constant 0 : i32
    return %arg1, %c0_i32, %c0_i32_0 : i32, i32, i32
  }
  func.func @transform_6(%arg0: i32, %arg1: i32) -> (i32, i32, i32) {
    %c0_i32 = arith.constant 0 : i32
    %c0_i32_0 = arith.constant 0 : i32
    %c0_i32_1 = arith.constant 0 : i32
    return %arg1, %c0_i32, %c0_i32_0 : i32, i32, i32
  }
  func.func @transform_7(%arg0: i32, %arg1: i32) -> (i32, i32, i32) {
    %c0_i32 = arith.constant 0 : i32
    %c0_i32_0 = arith.constant 0 : i32
    %c0_i32_1 = arith.constant 0 : i32
    return %arg1, %c0_i32, %c0_i32_0 : i32, i32, i32
  }
  func.func @transform_8(%arg0: i32, %arg1: i32) -> (i32, i32, i32) {
    %c0_i32 = arith.constant 0 : i32
    %c0_i32_0 = arith.constant 0 : i32
    %c0_i32_1 = arith.constant 0 : i32
    return %arg1, %c0_i32, %c0_i32_0 : i32, i32, i32
  }
  func.func @transform_9(%arg0: i32, %arg1: i32) -> (i32, i32, i32) {
    %c0_i32 = arith.constant 0 : i32
    %c0_i32_0 = arith.constant 0 : i32
    %c0_i32_1 = arith.constant 0 : i32
    return %arg1, %c0_i32, %c0_i32_0 : i32, i32, i32
  }
  func.func @transform_10(%arg0: i32, %arg1: i32) -> (i32, i32, i32) {
    %c0_i32 = arith.constant 0 : i32
    %c0_i32_0 = arith.constant 0 : i32
    %c0_i32_1 = arith.constant 0 : i32
    return %arg1, %c0_i32, %c0_i32_0 : i32, i32, i32
  }
  func.func @transform_11(%arg0: i32, %arg1: i32) -> (i32, i32, i32) {
    %c0_i32 = arith.constant 0 : i32
    %c0_i32_0 = arith.constant 0 : i32
    %c0_i32_1 = arith.constant 0 : i32
    return %arg1, %c0_i32, %c0_i32_0 : i32, i32, i32
  }
  func.func @transform_12(%arg0: i32, %arg1: i32) -> (i32, i32, i32) {
    %c0_i32 = arith.constant 0 : i32
    %c0_i32_0 = arith.constant 0 : i32
    %c0_i32_1 = arith.constant 0 : i32
    return %arg1, %c0_i32, %c0_i32_0 : i32, i32, i32
  }
  func.func @transform_13(%arg0: i32, %arg1: i32) -> (i32, i32, i32) {
    %c0_i32 = arith.constant 0 : i32
    %c0_i32_0 = arith.constant 0 : i32
    %c0_i32_1 = arith.constant 0 : i32
    return %arg1, %c0_i32, %c0_i32_0 : i32, i32, i32
  }
  func.func @transform_14(%arg0: i32, %arg1: i32) -> (i32, i32, i32) {
    %c0_i32 = arith.constant 0 : i32
    %c0_i32_0 = arith.constant 0 : i32
    %c0_i32_1 = arith.constant 0 : i32
    return %arg1, %c0_i32, %c0_i32_0 : i32, i32, i32
  }
  func.func @transform_15(%arg0: i32, %arg1: i32) -> (i32, i32, i32) {
    %c0_i32 = arith.constant 0 : i32
    %c0_i32_0 = arith.constant 0 : i32
    %c0_i32_1 = arith.constant 0 : i32
    return %arg1, %c0_i32, %c0_i32_0 : i32, i32, i32
  }
  func.func @transform_16(%arg0: i32, %arg1: i32) -> (i32, i32, i32) {
    %c0_i32 = arith.constant 0 : i32
    %c0_i32_0 = arith.constant 0 : i32
    %c0_i32_1 = arith.constant 0 : i32
    return %arg1, %c0_i32, %c0_i32_0 : i32, i32, i32
  }
  func.func @transform_17(%arg0: i32, %arg1: i32) -> (i32, i32, i32) {
    %c0_i32 = arith.constant 0 : i32
    %c0_i32_0 = arith.constant 0 : i32
    %c0_i32_1 = arith.constant 0 : i32
    return %arg1, %c0_i32, %c0_i32_0 : i32, i32, i32
  }
  func.func @transform_18(%arg0: i32, %arg1: i32) -> (i32, i32, i32) {
    %c0_i32 = arith.constant 0 : i32
    %c0_i32_0 = arith.constant 0 : i32
    %c0_i32_1 = arith.constant 0 : i32
    return %arg1, %c0_i32, %c0_i32_0 : i32, i32, i32
  }
  func.func @transform_19(%arg0: i32, %arg1: i32) -> (i32, i32, i32) {
    %c0_i32 = arith.constant 0 : i32
    %c0_i32_0 = arith.constant 0 : i32
    %c0_i32_1 = arith.constant 0 : i32
    return %arg1, %c0_i32, %c0_i32_0 : i32, i32, i32
  }
  func.func @transform_20(%arg0: i32, %arg1: i32) -> (i32, i32, i32) {
    %c0_i32 = arith.constant 0 : i32
    %c0_i32_0 = arith.constant 0 : i32
    %c0_i32_1 = arith.constant 0 : i32
    return %arg1, %c0_i32, %c0_i32_0 : i32, i32, i32
  }
  func.func @transform_21(%arg0: i32, %arg1: i32) -> (i32, i32, i32) {
    %c0_i32 = arith.constant 0 : i32
    %c0_i32_0 = arith.constant 0 : i32
    %c0_i32_1 = arith.constant 0 : i32
    return %arg1, %c0_i32, %c0_i32_0 : i32, i32, i32
  }
  func.func @transform_22(%arg0: i32, %arg1: i32) -> (i32, i32, i32) {
    %c0_i32 = arith.constant 0 : i32
    %c0_i32_0 = arith.constant 0 : i32
    %c0_i32_1 = arith.constant 0 : i32
    return %arg0, %c0_i32, %c0_i32_0 : i32, i32, i32
  }
}

</mosaic_0001>

<bundles_post_ra>
// kernel: tpu_custom_call.1
= control target key start
LH: loop header
LB: loop body
LE: loop exit
PB: predicated region body
PF: predicated region fallthrough
CT: control target
= control target key end

     0   :  { %s3778_s0 = inlined_call_operand.vmem [shape: f32[2,16,32], index: 0, kind: input, shape index: {}]   ;;  %s3779_s1 = inlined_call_operand.vmem [shape: f32[16,16], index: 1, kind: input, shape index: {}]   ;;  %s3780_s2 = inlined_call_operand.vmem [shape: f32[2,1,32], index: 2, kind: input, shape index: {}]   ;;  %s3781_s3 = inlined_call_operand.vmem [shape: f32[2,1,32], index: 3, kind: input, shape index: {}]   ;;  %s3782_s4 = inlined_call_operand.vmem [shape: bf16[2,32,96], index: 4, kind: input, shape index: {}]   ;;  %s3783_s5 = inlined_call_operand.vmem [shape: f32[2,1,96], index: 5, kind: input, shape index: {}]   ;;  %s3784_s6 = inlined_call_operand.vmem [shape: bf16[2,32,32], index: 6, kind: input, shape index: {}]   ;;  %s3785_s7 = inlined_call_operand.vmem [shape: f32[2,1,32], index: 7, kind: input, shape index: {}]   ;;  %s3786_s8 = inlined_call_operand.vmem [shape: f32[2,1,32], index: 8, kind: input, shape index: {}]   ;;  %s3787_s9 = inlined_call_operand.vmem [shape: f32[2,1,32], index: 9, kind: input, shape index: {}]   ;;  %s3788_s10 = inlined_call_operand.vmem [shape: bf16[2,32,128], index: 10, kind: input, shape index: {}]   ;;  %s3789_s11 = inlined_call_operand.vmem [shape: f32[2,1,128], index: 11, kind: input, shape index: {}]   ;;  %s3790_s12 = inlined_call_operand.vmem [shape: f32[2,1,128], index: 12, kind: input, shape index: {}]   ;;  %s3791_s13 = inlined_call_operand.vmem [shape: f32[2,1,128], index: 13, kind: input, shape index: {}]   ;;  %s3792_s14 = inlined_call_operand.vmem [shape: f32[2,9,128], index: 14, kind: input, shape index: {}]   ;;  %s3793_s15 = inlined_call_operand.vmem [shape: f32[2,1,128], index: 15, kind: input, shape index: {}]   ;;  %s3794_s16 = inlined_call_operand.vmem [shape: f32[2,1,128], index: 16, kind: input, shape index: {}]   ;;  %s3795_s17 = inlined_call_operand.vmem [shape: f32[2,1,128], index: 17, kind: input, shape index: {}]   ;;  %s3796_s18 = inlined_call_operand.vmem [shape: bf16[2,128,32], index: 18, kind: input, shape index: {}]   ;;  %s3797_s19 = inlined_call_operand.vmem [shape: f32[2,1,32], index: 19, kind: input, shape index: {}]   ;;  %s3798_s20 = inlined_call_operand.vmem [shape: f32[2,1,32], index: 20, kind: input, shape index: {}]   ;;  %s3799_s21 = inlined_call_operand.vmem [shape: f32[2,1,32], index: 21, kind: input, shape index: {}]   ;;  %s3800_s22 = inlined_call_operand.hbm [shape: f32[2,16,32], index: 22, kind: output, shape index: {}]  }
   0x1   :  { %3817 = sst [smem:[#allocation21_spill]] %s3778_s0 }
   0x2   :  { %3818 = sst [smem:[#allocation22_spill]] %s3780_s2 }
   0x3   :  { %3819 = sst [smem:[#allocation23_spill]] %s3781_s3 }
   0x4   :  { %3820 = sst [smem:[#allocation24_spill]] %s3782_s4 }
   0x5   :  { %3821 = sst [smem:[#allocation25_spill]] %s3783_s5 }
   0x6   :  { %3822 = sst [smem:[#allocation26_spill]] %s3784_s6 }
   0x7   :  { %3823 = sst [smem:[#allocation27_spill]] %s3785_s7 }
   0x8   :  { %3824 = sst [smem:[#allocation28_spill]] %s3788_s10 }
   0x9   :  { %3825 = sst [smem:[#allocation29_spill]] %s3791_s13 }
   0xa   :  { %3826 = sst [smem:[#allocation30_spill]] %s3792_s14 }
   0xb   :  { %3827 = sst [smem:[#allocation31_spill]] %s3793_s15 }
   0xc   :  { %3828 = sst [smem:[#allocation32_spill]] %s3794_s16 }
   0xd   :  { %3829 = sst [smem:[#allocation33_spill]] %s3796_s18 }
   0xe   :  { %3830 = sst [smem:[#allocation34_spill]] %s3797_s19 }
   0xf   :  { %3831 = sst [smem:[#allocation35_spill]] %s3798_s20 }
  0x10   :  { %3832 = sst [smem:[#allocation36_spill]] %s3799_s21 }
  0x11   :  { %3833 = sst [smem:[#allocation37_spill]] %s3800_s22 }
  0x12   :  { %27 = vsyncpa [#allocation5], 0 }
  0x13   :  { %29 = vsyncpa [#allocation5 + $0x1], 0  ;;  %s3254_s3 = smov 0   ;;  %s3256_s28 = smov 0  }
  0x14   :  { %s3258_s29 = smov 0   ;;  %s3260_s30 = smov 0  }
  0x15   :  { %s3262_s4 = smov 0   ;;  %s3264_s0 = smov 0  }
  0x16   :  { %s3266_s23 = smov 0   ;;  %s3268_s1 = smov 0  }
  0x17 LB: > { %3834 = sst [smem:[#allocation7_spill]] %s3089_s3  ;;  %s2641_s5 = sadd.s32 4294967295, %s3117_s1   ;;  %s3117_s1 = sphi %s3268_s1, %s35_s1   ;;  %s3113_s23 = sphi %s3266_s23, %s3904_s23   ;;  %s3109_s0 = sphi %s3264_s0, %s3903_s0   ;;  %s3105_s4 = sphi %s3262_s4, %s3902_s4   ;;  %s3101_s30 = sphi %s3260_s30, %s3901_s30   ;;  %s3097_s29 = sphi %s3258_s29, %s3900_s29   ;;  %s3093_s28 = sphi %s3256_s28, %s3899_s28   ;;  %s3089_s3 = sphi %s3254_s3, %s3898_s3  }
  0x18   : > { %3835 = sst [smem:[#allocation8_spill]] %s3093_s28  ;;  %s2642_s24 = sadd.s32 4294967294, %s3117_s1  }
  0x19   : > { %3836 = sst [smem:[#allocation9_spill]] %s3097_s29  ;;  %s44_s6 = sadd.s32 1, %s3109_s0 }
  0x1a   : > { %3837 = sst [smem:[#allocation10_spill]] %s3101_s30  ;;  %p45_p0 = scmp.ge.s32.totalorder %s44_s6, 2 }
  0x1b   : > { %3838 = sst [smem:[#allocation11_spill]] %s3105_s4  ;;  %s47_s25 = sadd.s32 1, %s3113_s23 }
  0x1c   : > { %3839 = sst [smem:[#allocation12_spill]] %s3109_s0  ;;  %p631_p1 = scmp.ne.s32.totalorder %s3097_s29, %s3093_s28 }
  0x1d   : > { %3840 = sst [smem:[#allocation13_spill]] %s3113_s23  ;;  %p632_p2 = scmp.eq.s32.totalorder %s2641_s5, 3 }
  0x1e   : > { %3841 = sst [smem:[#allocation14_spill]] %s3117_s1  ;;  %s3906_s6 = smov (%p45_p0, %s44_s6), 0 }
  0x1f   : > { %3842 = sst [smem:[#allocation15_spill]] %s3906_s6  ;;  %s3908_s25 = smov (!%p45_p0, %s47_s25), %s3113_s23 }
  0x20   : > { %p3303_p3 = por %p632_p2, %p631_p1  ;;  %p637_p4 = scmp.ne.s32.totalorder %s3093_s28, %s3089_s3 }
  0x21   : > { %p49_p5 = scmp.ge.s32.totalorder %s3908_s25, 2  ;;  %p638_p6 = scmp.eq.s32.totalorder %s2642_s24, 3 }
  0x22   : > { %s3843_s26 = scalar_select %p3303_p3, 1, 0 }
  0x23   : > { %p2645_p7 = scmp.ge.s32.totalorder %s3117_s1, 1  ;;  %p797_p8 = scmp.lt.s32.totalorder %s3117_s1, 5 }
  0x24   : > { %3844 = sst [smem:[#allocation16_spill]] %s3843_s26  ;;  %s3910_s25 = smov (%p49_p5, %s3908_s25), 0 }
  0x25   : > { %3845 = sst [smem:[#allocation17_spill]] %s3910_s25  ;;  %p3313_p9 = por %p638_p6, %p637_p4 }
  0x26   : > { %p798_p10 = pnand %p2645_p7, %p797_p8  ;;  %s618_s27 = ssub.s32 %s3113_s23, %s3910_s25 }
  0x27   : > { %s3846_s2 = scalar_select %p3313_p9, 1, 0 }
  0x28   : > { %s621_s5 = sadd.s32 1, %s3097_s29  ;;  %p619_p11 = scmp.eq.s32.totalorder %s618_s27, 0 }
  0x29   : > { %3847 = sst [smem:[#allocation18_spill]] %s3846_s2  ;;  %801 = sbr.rel (%p798_p10) target bundleno = 2762 (0xaca), region = 108 }
  0x2a   : > { %s3321_s6 = scalar_select %p619_p11, %s3097_s29, %s621_s5  }
  0x2c   : > { %3848 = sst [smem:[#allocation19_spill]] %s3321_s6 }
  0x30   : > { %s3806_s24 = sand.u32 1, %s3093_s28   ;;  %p929_p12 = scmp.lt.s32.totalorder %s3105_s4, 1 }
  0x31   : > { %s2646_s0 = sshll.u32 %s3806_s24, 4  ;;  %p934_p13 = scmp.lt.s32.totalorder %s3101_s30, 1 }
  0x32   : > { %s930_s3 = scalar_select %p929_p12, %s3105_s4, 1 }
  0x33   : > { %s3330_s2 = scalar_select %p934_p13, %s3101_s30, 1 }
  0x34   : > { %s2707_s27 = sshll.u32 %s930_s3, 4  ;;  %s3849_s23 = sld [smem:[#allocation21_spill]] }
  0x35   : > { %s2708_s21 = sshll.u32 %s3330_s2, 4  ;;  %s3852_s3 = sld [smem:[#allocation24_spill]] }
  0x36   : > { %s3855_s1 = sld [smem:[#allocation26_spill]]  ;;  %s3857_s10 = sld [smem:[#allocation28_spill]] }
  0x37   : > { %s3859_s14 = sld [smem:[#allocation30_spill]]  ;;  %s989_s4 = scalar_lea.vmem %s3795_s17, %s3330_s2 }
  0x38   : > { %s2712_s26 = sshll.u32 %s3330_s2, 6  ;;  %s3862_s18 = sld [smem:[#allocation34_spill]] }
  0x39   : > { %s3864_s25 = sld [smem:[#allocation35_spill]]  ;;  %s3422_s5 = scalar_lea.vmem [#allocation4], %s2646_s0 }
  0x3a   : > { %s933_s24 = scalar_lea.vmem %s3849_s23, %s2707_s27  ;;  %s3866_s28 = sld [smem:[#allocation10_spill]] }
  0x3b   : > { %s3347_s19 = scalar_lea.vmem %s3852_s3, %s2708_s21 }
  0x3c   : > { %3853 = sst [smem:[#allocation20_spill]] %s3347_s19  ;;  %s3356_s22 = scalar_lea.vmem %s3855_s1, %s2708_s21 }
  0x3d   : > { %s3373_s29 = scalar_lea.vmem %s3857_s10, %s2708_s21  ;;  %s3390_s3 = scalar_lea.vmem %s3859_s14, %s2708_s21 }
  0x3e   : > { %s997_s13 = scalar_lea.vmem %s3862_s18, %s3330_s2  ;;  %s3863_s19 = sld [smem:[#allocation33_spill]] }
  0x3f   : > { %s1000_s15 = scalar_lea.vmem %s3864_s25, %s3330_s2  ;;  %s3865_s1 = sld [smem:[#allocation36_spill]] }
  0x40   : > { %p2659_p0 = scmp.ne.s32.totalorder %s3866_s28, 0 }
  0x41   : > { %v1009_v0 = vld [vmem:[%s933_s24] sm:$0xff] (!%p2659_p0)  ;;  %vm1011_vm0 = vcmask (!%p2659_p0), 261120   ;;  %v1010_v1 = vld [vmem:[%s933_s24 + $0x8] sm:$0xff] (!%p2659_p0)  ;;  %v3119_v2 = vmov (!%p2659_p0), 0.0  }
  0x42   : > { %1008 = sbr.rel (%p2659_p0) target bundleno = 73 (0x49), region = 112  ;;  %1012 = vst.msk [vmem:[#allocation2] sm:$0xff] (!%p2659_p0), %vm1011_vm0, %v1009_v0  ;;  %1013 = vst.msk [vmem:[#allocation2 + $0x8] sm:$0xff] (!%p2659_p0), %vm1011_vm0, %v1010_v1 }
  0x43   : > { %1014 = vst [vmem:[#allocation3] sm:$0x3f] (!%p2659_p0), %v3119_v2  ;;  %1015 = vst [vmem:[#allocation3 + $0x8] sm:$0x3f] (!%p2659_p0), %v3119_v2 }
  0x44   : > { %s3412_s14 = scalar_lea.vmem %s3863_s19, %s2712_s26  ;;  %1016 = vst [vmem:[#allocation3 + $0x10] sm:$0x3f] (!%p2659_p0), %v3119_v2  ;;  %1017 = vst [vmem:[#allocation3 + $0x18] sm:$0x3f] (!%p2659_p0), %v3119_v2 }
  0x45   : > { %s1003_s16 = scalar_lea.vmem %s3865_s1, %s3330_s2  ;;  %1018 = vst [vmem:[#allocation3 + $0x20] sm:$0x3f] (!%p2659_p0), %v3119_v2  ;;  %1019 = vst [vmem:[#allocation3 + $0x28] sm:$0x3f] (!%p2659_p0), %v3119_v2 }
  0x49 PF: > { %v3425_v3 = vld [vmem:[#allocation2] sm:$0xff]  ;;  %vm1024_vm1 = vcmask 261120   ;;  %v3427_v4 = vld [vmem:[#allocation2 + $0x8] sm:$0xff]  ;;  %s3867_s0 = sld [smem:[#allocation20_spill]]  ;;  %v3120_v18 = vmov 0.0   ;;  %vm3121_vm2 = vmmov 0  }
  0x4a   : > { %v1025_v5 = vsel %vm1024_vm1, %v3425_v3, 0.0  ;;  %v1028_v6 = vsel %vm1024_vm1, %v3427_v4, 0.0  ;;  %2748 = vmatprep.subr.bf16.mxu0 %v3120_v18  ;;  %2768 = vmatprep.subr.bf16.mxu1 %v3120_v18  ;;  %s3868_s25 = sld [smem:[#allocation22_spill]]  ;;  %s3870_s30 = sld [smem:[#allocation23_spill]]  ;;  %vm1140_vm3 = vcmask 64512   ;;  %vm1190_vm4 = vcmask 130048  }
  0x4b   : > { %1026 = vadd.xlane.f32.xlu0 %v1025_v5  ;;  %2752 = vmatprep.mubr.msk.bf16.mxu0 %vm3121_vm2, %v3120_v18  ;;  %s3872_s23 = sld [smem:[#allocation25_spill]]  ;;  %s3122_s10 = smov 88   ;;  %vm1658_vm5 = vcmask 195584  }
  0x4c   : > { %2770 = vmatprep.mubr.msk.bf16.mxu1 %vm3121_vm2, %v3120_v18  ;;  %s3123_s6 = smov 96   ;;  %s3124_s28 = smov 120  }
  0x4d   : > { %s3126_s24 = smov 80   ;;  %s3127_s26 = smov 104  }
  0x4e   : > { %s3130_s1 = smov 48   ;;  %s3131_s7 = smov 40  }
  0x4f   : > { %1029 = vadd.xlane.f32.xlu0 %v1028_v6  ;;  %v2945_v17 = vld [vmem:[%s3867_s0] sm:$0xff]   ;;  %v2946_v19 = vld [vmem:[%s3867_s0 + $0x8] sm:$0xff]   ;;  %s3125_s0 = smov 112   ;;  %s3134_s21 = smov 16  }
  0x50   : > { %2749 = vmatpush3.bf16.msra.mxu0 %v2945_v17  ;;  %s3869_s18 = scalar_lea.vmem %s3868_s25, %s3330_s2  ;;  %s3871_s20 = scalar_lea.vmem %s3870_s30, %s3330_s2 }
  0x51   : > { %2750 = vmatprep.subr.bf16.mxu0 %v3120_v18  ;;  %v2660_v28 = vld [vmem:[%s3869_s18] ss:$0 sm:$0xff]  ;;  %s3873_s27 = scalar_lea.vmem %s3872_s23, %s3330_s2  ;;  %s3128_s25 = smov 72  }
  0x52   : > { %v2661_v32 = vld [vmem:[%s3871_s20] ss:$0 sm:$0xff]  ;;  %s3129_s18 = smov 64   ;;  %s3132_s30 = smov 56  }
  0x53   : > { %v2662_v37 = vld [vmem:[%s3873_s27] ss:$0 sm:$0xff]  ;;  %s3133_s20 = smov 8   ;;  %s3135_s19 = smov 24  }
  0x54   : > { %2751 = vmatpush3.bf16.msra.mxu0 %v2946_v19  ;;  %s3874_s27 = sld [smem:[#allocation27_spill]]  ;;  %s3880_s23 = sld [smem:[#allocation29_spill]] }
  0x55   : > { %2756 = vmatprep.subr.bf16.mxu0 %v3120_v18 }
  0xd8   : > { %v1027_v7 = vpop.xlane.xlu0 %1026 }
  0xd9   : > { %v1032_v8 = vmul.f32 0.03125, %v1027_v7 }
  0xdb   : > { %v1034_v9 = vsub.f32 %v3425_v3, %v1032_v8 }
  0xdc   : > { %v1030_v10 = vpop.xlane.xlu0 %1029 }
  0xdd   : > { %v1033_v11 = vmul.f32 0.03125, %v1030_v10  ;;  %v1036_v12 = vmul.f32 %v1034_v9, %v1034_v9 }
  0xdf   : > { %v1035_v13 = vsub.f32 %v3427_v4, %v1033_v11  ;;  %v1038_v14 = vsel %vm1024_vm1, %v1036_v12, 0.0 }
  0xe0   : > { %1039 = vadd.xlane.f32.xlu1 %v1038_v14 }
  0xe1   : > { %v1037_v15 = vmul.f32 %v1035_v13, %v1035_v13 }
  0xe3   : > { %v1041_v16 = vsel %vm1024_vm1, %v1037_v15, 0.0 }
  0xe4   : > { %1042 = vadd.xlane.f32.xlu1 %v1041_v16 }
 0x16d   : > { %v1040_v20 = vpop.xlane.xlu1 %1039 }
 0x16e   : > { %v1044_v21 = vmul.f32 0.03125, %v1040_v20 }
 0x170   : > { %v1046_v22 = vadd.f32 1e-06, %v1044_v21 }
 0x171   : > { %v1043_v23 = vpop.xlane.xlu1 %1042 }
 0x172   : > { %2959 = vrsqrt.f32 %v1046_v22  ;;  %v1045_v24 = vmul.f32 0.03125, %v1043_v23 }
 0x174   : > { %v1047_v25 = vadd.f32 1e-06, %v1045_v24 }
 0x176   : > { %2961 = vrsqrt.f32 %v1047_v25 }
 0x17c   : > { %v2960_v26 = vpop.eup %2959 }
 0x17d   : > { %v1050_v27 = vmul.f32 %v2960_v26, %v1034_v9 }
 0x17f   : > { %v1058_v31 = vmul.f32 %v2660_v28, %v1050_v27 }
 0x180   : > { %v2962_v29 = vpop.eup %2961 }
 0x181   : > { %v1051_v30 = vmul.f32 %v2962_v29, %v1035_v13  ;;  %v1066_v34 = vadd.f32 %v2661_v32, %v1058_v31 }
 0x183   : > { %v1059_v33 = vmul.f32 %v2660_v28, %v1051_v30 }
 0x185   : > { %v1067_v35 = vadd.f32 %v2661_v32, %v1059_v33 }
 0x187   : > { %v1068_v36 = vpack.c.bf16 %v1067_v35, %v1066_v34 }
 0x189   : > { %2753 = vmatmul.mubr.msk.bf16.vlgmr.msra.gmra.mrb[0].mxu0 %vm1024_vm1, %v1068_v36 }
 0x18a   : > { %2758 = vmatprep.mubr.msk.bf16.mxu0 %vm3121_vm2, %v3120_v18 }
 0x25c   : > { %v1129_v38 = vpop.f32.mrb[0].mxu0 }
 0x25d   : > { %v2754_v39 = vpop.f32.mrb[1].mxu0  ;;  %v1130_v41 = vadd.f32 %v2662_v37, %v1129_v38 }
 0x25e   : > { %v1132_v40 = vpop.f32.mrb[2].mxu0 }
 0x25f   : > { %v1133_v42 = vadd.f32 %v2662_v37, %v1132_v40  ;;  %v2755_v43 = vpop.f32.mrb[3].mxu0 }
 0x261   : > { %v3465_v44 = vpack.c.bf16 %v1133_v42, %v1130_v41 }
 0x263   : > { %1263 = vrot.lane.b32.xlu1 %v3465_v44, %s3122_s10  ;;  %1138 = vrot.lane.b32.xlu0 %v3465_v44, %s3123_s6  ;;  %s3875_s10 = scalar_lea.vmem %s3874_s27, %s3330_s2 }
 0x267   : > { %1261 = vrot.lane.b32.xlu1 %v3465_v44, %s3124_s28  ;;  %1384 = vrot.lane.b32.xlu0 %v3465_v44, %s3125_s0  ;;  %s3884_s0 = sld [smem:[#allocation32_spill]] }
 0x26b   : > { %1386 = vrot.lane.b32.xlu1 %v3465_v44, %s3126_s24  ;;  %1507 = vrot.lane.b32.xlu0 %v3465_v44, %s3127_s26  ;;  %s3877_s26 = scalar_lea.vmem %s3787_s9, %s3330_s2 }
 0x26d   : > { %s3885_s24 = scalar_lea.vmem %s3884_s0, %s3330_s2 }
 0x26f   : > { %1509 = vrot.lane.b32.xlu1 %v3465_v44, %s3128_s25 }
 0x2d5   : > { %v1264_v45 = vpop.permute.xlu1 %1263  ;;  %v1139_v46 = vpop.permute.xlu0 %1138 }
 0x2d6   : > { %v1145_v47 = vsel %vm1140_vm3, %v1139_v46, 0  ;;  %v1269_v48 = vsel %vm1140_vm3, %v1264_v45, 0 }
 0x2d7   : > { %2757 = vmatpush3.bf16.xpose.msra.mxu0 %v1145_v47  ;;  %2769 = vmatpush3.bf16.xpose.msra.mxu1 %v1269_v48 }
 0x2d8   : > { %2780 = vmatprep.subr.bf16.mxu1 %v3120_v18  ;;  %2762 = vmatprep.subr.bf16.mxu0 %v3120_v18 }
 0x2d9   : > { %v1262_v49 = vpop.permute.xlu1 %1261  ;;  %v1385_v53 = vpop.permute.xlu0 %1384 }
 0x2dd   : > { %v1387_v50 = vpop.permute.xlu1 %1386  ;;  %v1508_v55 = vpop.permute.xlu0 %1507 }
 0x2de   : > { %v1392_v51 = vsel %vm1140_vm3, %v1387_v50, 0  ;;  %2759 = vmatmul.mubr.msk.bf16.vlgmr.msra.gmra.mrb[4].mxu0 %vm1140_vm3, %v3465_v44  ;;  %2771 = vmatmul.mubr.msk.bf16.vlgmr.msra.gmra.mrb[0].mxu1 %vm1140_vm3, %v1262_v49 }
 0x2df   : > { %2781 = vmatpush3.bf16.xpose.msra.mxu1 %v1392_v51  ;;  %2782 = vmatprep.mubr.msk.bf16.mxu1 %vm3121_vm2, %v3120_v18 }
 0x2e0   : > { %2792 = vmatprep.subr.bf16.mxu1 %v3120_v18  ;;  %2764 = vmatprep.mubr.msk.bf16.mxu0 %vm3121_vm2, %v3120_v18 }
 0x2e1   : > { %v1510_v52 = vpop.permute.xlu1 %1509 }
 0x2e2   : > { %v1515_v54 = vsel %vm1140_vm3, %v1510_v52, 0 }
 0x2e6   : > { %2783 = vmatmul.mubr.msk.bf16.vlgmr.msra.gmra.mrb[4].mxu1 %vm1140_vm3, %v1385_v53 }
 0x2e7   : > { %2793 = vmatpush3.bf16.xpose.msra.mxu1 %v1515_v54  ;;  %2794 = vmatprep.mubr.msk.bf16.mxu1 %vm3121_vm2, %v3120_v18 }
 0x2e8   : > { %2804 = vmatprep.subr.bf16.mxu1 %v3120_v18 }
 0x2ee   : > { %2795 = vmatmul.mubr.msk.bf16.vlgmr.msra.gmra.mrb[8].mxu1 %vm1140_vm3, %v1508_v55 }
 0x2ef   : > { %2808 = vmatprep.mubr.msk.bf16.mxu1 %vm3121_vm2, %v3120_v18 }
 0x3b1   : > { %v1181_v56 = vpop.f32.mrb[4].mxu0  ;;  %v1305_v57 = vpop.f32.mrb[0].mxu1 }
 0x3b2   : > { %v1188_v58 = vmul.f32 0.35355338, %v1181_v56  ;;  %v2760_v59 = vpop.f32.mrb[5].mxu0  ;;  %v2772_v60 = vpop.f32.mrb[1].mxu1  ;;  %v1312_v5 = vmul.f32 0.35355338, %v1305_v57 }
 0x3b3   : > { %v1184_v61 = vpop.f32.mrb[6].mxu0  ;;  %v1308_v62 = vpop.f32.mrb[2].mxu1 }
 0x3b4   : > { %v1189_v63 = vmul.f32 0.35355338, %v1184_v61  ;;  %v2761_v0 = vpop.f32.mrb[7].mxu0  ;;  %v2773_v1 = vpop.f32.mrb[3].mxu1  ;;  %v1191_v2 = vsel %vm1190_vm4, %v1188_v58, -inf  ;;  %v1314_v11 = vsel %vm1190_vm4, %v1312_v5, -inf }
 0x3b5   : > { %1192 = vmax.xlane.f32.xlu1 %v1191_v2  ;;  %v1313_v8 = vmul.f32 0.35355338, %v1308_v62 }
 0x3b6   : > { %v1194_v6 = vsel %vm1190_vm4, %v1189_v63, -inf }
 0x3b7   : > { %1195 = vmax.xlane.f32.xlu0 %v1194_v6  ;;  %v1317_v16 = vsel %vm1190_vm4, %v1313_v8, -inf }
 0x3b9   : > { %v1428_v7 = vpop.f32.mrb[4].mxu1 }
 0x3ba   : > { %v1435_v9 = vmul.f32 0.35355338, %v1428_v7  ;;  %v2784_v10 = vpop.f32.mrb[5].mxu1 }
 0x3bb   : > { %v1431_v12 = vpop.f32.mrb[6].mxu1  ;;  %1315 = vmax.xlane.f32.xlu0 %v1314_v11 }
 0x3bc   : > { %v2785_v13 = vpop.f32.mrb[7].mxu1  ;;  %v1437_v14 = vsel %vm1190_vm4, %v1435_v9, -inf  ;;  %v1436_v15 = vmul.f32 0.35355338, %v1431_v12 }
 0x3bd   : > { %1438 = vmax.xlane.f32.xlu1 %v1437_v14 }
 0x3be   : > { %v1440_v21 = vsel %vm1190_vm4, %v1436_v15, -inf }
 0x3bf   : > { %1318 = vmax.xlane.f32.xlu0 %v1317_v16 }
 0x3c1   : > { %v1551_v17 = vpop.f32.mrb[8].mxu1 }
 0x3c2   : > { %v1558_v19 = vmul.f32 0.35355338, %v1551_v17  ;;  %v2796_v20 = vpop.f32.mrb[9].mxu1 }
 0x3c3   : > { %v1554_v22 = vpop.f32.mrb[10].mxu1  ;;  %1441 = vmax.xlane.f32.xlu0 %v1440_v21 }
 0x3c4   : > { %v1559_v23 = vmul.f32 0.35355338, %v1554_v22  ;;  %v2797_v24 = vpop.f32.mrb[11].mxu1  ;;  %v1560_v25 = vsel %vm1190_vm4, %v1558_v19, -inf }
 0x3c5   : > { %1561 = vmax.xlane.f32.xlu1 %v1560_v25 }
 0x3c6   : > { %v1563_v26 = vsel %vm1190_vm4, %v1559_v23, -inf }
 0x3c7   : > { %1564 = vmax.xlane.f32.xlu0 %v1563_v26 }
 0x3d6   : > { %1214 = vrot.lane.b32.xlu1 %v3465_v44, %s3129_s18 }
 0x442   : > { %v1193_v27 = vpop.xlane.xlu1 %1192 }
 0x443   : > { %v1197_v28 = vsub.f32 %v1188_v58, %v1193_v27 }
 0x444   : > { %v1196_v29 = vpop.xlane.xlu0 %1195 }
 0x445   : > { %v1198_v30 = vsub.f32 %v1189_v63, %v1196_v29  ;;  %v1199_v31 = vmul.f32 1.442695, %v1197_v28 }
 0x447   : > { %v1201_v32 = vmul.f32 1.442695, %v1198_v30  ;;  %2963 = vpow2.f32 %v1199_v31 }
 0x448   : > { %v1316_v33 = vpop.xlane.xlu0 %1315 }
 0x449   : > { %2965 = vpow2.f32 %v1201_v32  ;;  %v1320_v34 = vsub.f32 %v1312_v5, %v1316_v33 }
 0x44a   : > { %v1439_v35 = vpop.xlane.xlu1 %1438 }
 0x44b   : > { %v1322_v36 = vmul.f32 1.442695, %v1320_v34  ;;  %v1443_v37 = vsub.f32 %v1435_v9, %v1439_v35 }
 0x44c   : > { %v1319_v38 = vpop.xlane.xlu0 %1318 }
 0x44d   : > { %2967 = vpow2.f32 %v1322_v36  ;;  %v1445_v39 = vmul.f32 1.442695, %v1443_v37  ;;  %v1321_v40 = vsub.f32 %v1313_v8, %v1319_v38 }
 0x44f   : > { %2969 = vpow2.f32 %v1445_v39  ;;  %v1324_v41 = vmul.f32 1.442695, %v1321_v40 }
 0x450   : > { %v1442_v42 = vpop.xlane.xlu0 %1441 }
 0x451   : > { %2971 = vpow2.f32 %v1324_v41  ;;  %v1444_v43 = vsub.f32 %v1436_v15, %v1442_v42  ;;  %v2964_v45 = vpop.eup %2963 }
 0x452   : > { %v1562_v46 = vpop.xlane.xlu1 %1561  ;;  %v1203_v50 = vsel %vm1190_vm4, %v2964_v45, 0.0 }
 0x453   : > { %v2966_v47 = vpop.eup %2965  ;;  %v1447_v48 = vmul.f32 1.442695, %v1444_v43  ;;  %v1566_v49 = vsub.f32 %v1558_v19, %v1562_v46  ;;  %1204 = vadd.xlane.f32.xlu1 %v1203_v50  ;;  %v2947_v46 = vld [vmem:[%s3356_s22] sm:$0xff]  }
 0x454   : > { %v1565_v51 = vpop.xlane.xlu0 %1564  ;;  %v1206_v52 = vsel %vm1190_vm4, %v2966_v47, 0.0  ;;  %2805 = vmatpush3.bf16.msra.mxu1 %v2947_v46 }
 0x455   : > { %2973 = vpow2.f32 %v1447_v48  ;;  %v1568_v53 = vmul.f32 1.442695, %v1566_v49  ;;  %v1567_v54 = vsub.f32 %v1559_v23, %v1565_v51  ;;  %1207 = vadd.xlane.f32.xlu0 %v1206_v52  ;;  %2806 = vmatprep.subr.bf16.mxu1 %v3120_v18  ;;  %v2948_v51 = vld [vmem:[%s3356_s22 + $0x8] sm:$0xff]  }
 0x456   : > { %v1215_v55 = vpop.permute.xlu1 %1214 }
 0x457   : > { %v2968_v56 = vpop.eup %2967  ;;  %2975 = vpow2.f32 %v1568_v53  ;;  %v1570_v57 = vmul.f32 1.442695, %v1567_v54  ;;  %2763 = vmatpush3.bf16.msra.mxu0 %v1215_v55 }
 0x458   : > { %v1326_v58 = vsel %vm1190_vm4, %v2968_v56, 0.0  ;;  %2774 = vmatprep.subr.bf16.mxu0 %v3120_v18  ;;  %2807 = vmatpush3.bf16.msra.mxu1 %v2948_v51 }
 0x459   : > { %v2970_v59 = vpop.eup %2969  ;;  %2977 = vpow2.f32 %v1570_v57  ;;  %1327 = vadd.xlane.f32.xlu1 %v1326_v58  ;;  %2820 = vmatprep.subr.bf16.mxu1 %v3120_v18 }
 0x45a   : > { %v1449_v61 = vsel %vm1190_vm4, %v2970_v59, 0.0 }
 0x45b   : > { %v2972_v60 = vpop.eup %2971 }
 0x45c   : > { %v1329_v62 = vsel %vm1190_vm4, %v2972_v60, 0.0 }
 0x45d   : > { %1450 = vadd.xlane.f32.xlu1 %v1449_v61  ;;  %1330 = vadd.xlane.f32.xlu0 %v1329_v62 }
 0x45f   : > { %v2974_v63 = vpop.eup %2973 }
 0x460   : > { %v1452_v0 = vsel %vm1190_vm4, %v2974_v63, 0.0 }
 0x461   : > { %v2976_v1 = vpop.eup %2975  ;;  %1453 = vadd.xlane.f32.xlu0 %v1452_v0 }
 0x462   : > { %v1572_v2 = vsel %vm1190_vm4, %v2976_v1, 0.0 }
 0x463   : > { %v2978_v5 = vpop.eup %2977  ;;  %1573 = vadd.xlane.f32.xlu1 %v1572_v2 }
 0x464   : > { %v1575_v6 = vsel %vm1190_vm4, %v2978_v5, 0.0 }
 0x465   : > { %1576 = vadd.xlane.f32.xlu0 %v1575_v6 }
 0x474   : > { %1460 = vrot.lane.b32.xlu1 %v3465_v44, %s3130_s1  ;;  %s3878_s1 = scalar_lea.vmem %s3789_s11, %s3330_s2 }
 0x478   : > { %1583 = vrot.lane.b32.xlu1 %v3465_v44, %s3131_s7 }
 0x47b   : > { %1337 = vrot.lane.b32.xlu0 %v3465_v44, %s3132_s30 }
 0x4e0   : > { %v1205_v7 = vpop.xlane.xlu1 %1204 }
 0x4e1   : > { %2979 = vrcp.f32 %v1205_v7 }
 0x4e2   : > { %v1208_v8 = vpop.xlane.xlu0 %1207 }
 0x4e3   : > { %2981 = vrcp.f32 %v1208_v8 }
 0x4e6   : > { %v1328_v9 = vpop.xlane.xlu1 %1327 }
 0x4e7   : > { %2983 = vrcp.f32 %v1328_v9 }
 0x4ea   : > { %v1331_v10 = vpop.xlane.xlu0 %1330  ;;  %v1451_v16 = vpop.xlane.xlu1 %1450 }
 0x4eb   : > { %v2980_v11 = vpop.eup %2979  ;;  %2985 = vrcp.f32 %v1331_v10 }
 0x4ec   : > { %v1211_v13 = vmul.f32 %v2980_v11, %v2964_v45 }
 0x4ed   : > { %v2982_v12 = vpop.eup %2981 }
 0x4ee   : > { %v1212_v14 = vmul.f32 %v2982_v12, %v2966_v47  ;;  %v1454_v15 = vpop.xlane.xlu0 %1453 }
 0x4ef   : > { %2987 = vrcp.f32 %v1454_v15 }
 0x4f0   : > { %v1213_v17 = vpack.c.bf16 %v1212_v14, %v1211_v13  ;;  %2989 = vrcp.f32 %v1451_v16  ;;  %v1574_v20 = vpop.xlane.xlu1 %1573  ;;  %v2674_v14 = vld [vmem:[%s3875_s10] ss:$0 sm:$0xff]  ;;  %s3882_s10 = sld [smem:[#allocation31_spill]] }
 0x4f1   : > { %v2984_v19 = vpop.eup %2983 }
 0x4f2   : > { %2765 = vmatmul.mubr.msk.bf16.vlgmr.msra.gmra.mrb[8].mxu0 %vm1190_vm4, %v1213_v17  ;;  %v1577_v44 = vpop.xlane.xlu0 %1576  ;;  %v1334_v23 = vmul.f32 %v2984_v19, %v2968_v56 }
 0x4f3   : > { %2776 = vmatprep.mubr.msk.bf16.mxu0 %vm3121_vm2, %v3120_v18  ;;  %2991 = vrcp.f32 %v1577_v44 }
 0x4f4   : > { %2993 = vrcp.f32 %v1574_v20  ;;  %v1461_v27 = vpop.permute.xlu1 %1460 }
 0x4f5   : > { %v2986_v21 = vpop.eup %2985 }
 0x4f6   : > { %v1338_v22 = vpop.permute.xlu0 %1337  ;;  %v1335_v24 = vmul.f32 %v2986_v21, %v2972_v60  ;;  %s3883_s6 = scalar_lea.vmem %s3882_s10, %s3330_s2 }
 0x4f7   : > { %2775 = vmatpush3.bf16.msra.mxu0 %v1338_v22 }
 0x4f8   : > { %2786 = vmatprep.subr.bf16.mxu0 %v3120_v18  ;;  %v1336_v25 = vpack.c.bf16 %v1335_v24, %v1334_v23  ;;  %v1584_v33 = vpop.permute.xlu1 %1583 }
 0x4f9   : > { %v2988_v26 = vpop.eup %2987 }
 0x4fa   : > { %2777 = vmatmul.mubr.msk.bf16.vlgmr.msra.gmra.mrb[12].mxu0 %vm1190_vm4, %v1336_v25  ;;  %v2990_v28 = vpop.eup %2989  ;;  %v1458_v29 = vmul.f32 %v2988_v26, %v2974_v63 }
 0x4fb   : > { %2787 = vmatpush3.bf16.msra.mxu0 %v1461_v27  ;;  %2788 = vmatprep.mubr.msk.bf16.mxu0 %vm3121_vm2, %v3120_v18  ;;  %v1457_v30 = vmul.f32 %v2990_v28, %v2970_v59 }
 0x4fc   : > { %2798 = vmatprep.subr.bf16.mxu0 %v3120_v18 }
 0x4fd   : > { %v1459_v31 = vpack.c.bf16 %v1458_v29, %v1457_v30  ;;  %v2992_v32 = vpop.eup %2991 }
 0x4fe   : > { %v2994_v34 = vpop.eup %2993  ;;  %v1581_v35 = vmul.f32 %v2992_v32, %v2978_v5 }
 0x4ff   : > { %v1580_v36 = vmul.f32 %v2994_v34, %v2976_v1  ;;  %v2950_v34 = vld [vmem:[%s3373_s29 + $0x8] sm:$0xff]  }
 0x501   : > { %v1582_v37 = vpack.c.bf16 %v1581_v35, %v1580_v36 }
 0x502   : > { %2789 = vmatmul.mubr.msk.bf16.vlgmr.msra.gmra.mrb[16].mxu0 %vm1190_vm4, %v1459_v31 }
 0x503   : > { %2799 = vmatpush3.bf16.msra.mxu0 %v1584_v33  ;;  %2800 = vmatprep.mubr.msk.bf16.mxu0 %vm3121_vm2, %v3120_v18  ;;  %v2949_v33 = vld [vmem:[%s3373_s29] sm:$0xff]   ;;  %s3876_s29 = scalar_lea.vmem %s3786_s8, %s3330_s2 }
 0x504   : > { %2812 = vmatprep.subr.bf16.mxu0 %v3120_v18 }
 0x50a   : > { %2801 = vmatmul.mubr.msk.bf16.vlgmr.msra.gmra.mrb[20].mxu0 %vm1190_vm4, %v1582_v37 }
 0x50b   : > { %2816 = vmatprep.mubr.msk.bf16.mxu0 %vm3121_vm2, %v3120_v18  ;;  %2813 = vmatpush3.bf16.msra.mxu0 %v2949_v33 }
 0x50c   : > { %2814 = vmatprep.subr.bf16.mxu0 %v3120_v18 }
 0x50f   : > { %2815 = vmatpush3.bf16.msra.mxu0 %v2950_v34 }
 0x5c5   : > { %v1254_v38 = vpop.f32.mrb[8].mxu0 }
 0x5c6   : > { %v2766_v39 = vpop.f32.mrb[9].mxu0 }
 0x5c7   : > { %v1257_v40 = vpop.f32.mrb[10].mxu0 }
 0x5c8   : > { %v2767_v41 = vpop.f32.mrb[11].mxu0 }
 0x5cd   : > { %v1377_v42 = vpop.f32.mrb[12].mxu0 }
 0x5ce   : > { %v2778_v43 = vpop.f32.mrb[13].mxu0 }
 0x5cf   : > { %v1380_v45 = vpop.f32.mrb[14].mxu0  ;;  %v2678_v43 = vld [vmem:[%s3876_s29] ss:$0 sm:$0xff] }
 0x5d0   : > { %v2930_v47 = vpack.i.bf16 %v1380_v45, %v1377_v42  ;;  %v2779_v48 = vpop.f32.mrb[15].mxu0 }
 0x5d1   : > { %v2679_v48 = vld [vmem:[%s3877_s26] ss:$0 sm:$0xff] }
 0x5d2   : > { %2931 = vrot.lane.b32.xlu1 %v2930_v47, %s3133_s20 }
 0x5d5   : > { %v1500_v49 = vpop.f32.mrb[16].mxu0 }
 0x5d6   : > { %v2790_v50 = vpop.f32.mrb[17].mxu0 }
 0x5d7   : > { %v1503_v52 = vpop.f32.mrb[18].mxu0 }
 0x5d8   : > { %v2935_v53 = vpack.i.bf16 %v1503_v52, %v1500_v49  ;;  %v2791_v54 = vpop.f32.mrb[19].mxu0 }
 0x5d9   : > { %v2952_v54 = vld [vmem:[%s3412_s14 + $0x8] sm:$0xff]  }
 0x5da   : > { %2936 = vrot.lane.b32.xlu0 %v2935_v53, %s3134_s21  ;;  %v2951_v53 = vld [vmem:[%s3412_s14] sm:$0xff]   ;;  %s3879_s21 = scalar_lea.vmem %s3790_s12, %s3330_s2 }
 0x5dd   : > { %v1623_v55 = vpop.f32.mrb[20].mxu0 }
 0x5de   : > { %v2802_v56 = vpop.f32.mrb[21].mxu0 }
 0x5df   : > { %v1626_v57 = vpop.f32.mrb[22].mxu0  ;;  %v2954_v56 = vld [vmem:[%s3412_s14 + $0x18] sm:$0xff]  }
 0x5e0   : > { %v2940_v58 = vpack.i.bf16 %v1626_v57, %v1623_v55  ;;  %v2803_v59 = vpop.f32.mrb[23].mxu0  ;;  %v2953_v55 = vld [vmem:[%s3412_s14 + $0x10] sm:$0xff]   ;;  %v2955_v57 = vld [vmem:[%s3412_s14 + $0x20] sm:$0xff]  }
 0x5e1   : > { %v2957_v59 = vld [vmem:[%s3412_s14 + $0x30] sm:$0xff]  }
 0x5e2   : > { %2941 = vrot.lane.b32.xlu1 %v2940_v58, %s3135_s19  ;;  %v2956_v58 = vld [vmem:[%s3412_s14 + $0x28] sm:$0xff]  }
 0x644   : > { %v2932_v60 = vpop.permute.xlu1 %2931 }
 0x645   : > { %v2934_v62 = vunpack.i.h.bf16 %v2932_v60  ;;  %v2933_v63 = vunpack.i.l.bf16 %v2932_v60  ;;  %v2958_v60 = vld [vmem:[%s3412_s14 + $0x38] sm:$0xff]   ;;  %s3881_s14 = scalar_lea.vmem %s3880_s23, %s3330_s2 }
 0x647   : > { %v1655_v5 = vsel %vm1140_vm3, %v1257_v40, %v2934_v62  ;;  %v1654_v6 = vsel %vm1140_vm3, %v1254_v38, %v2933_v63  ;;  %v2684_v63 = vld [vmem:[%s3879_s21] ss:$0 sm:$0xff] }
 0x64c   : > { %v2937_v61 = vpop.permute.xlu0 %2936 }
 0x64d   : > { %v2939_v0 = vunpack.i.h.bf16 %v2937_v61  ;;  %v2938_v1 = vunpack.i.l.bf16 %v2937_v61  ;;  %v2680_v61 = vld [vmem:[%s3878_s1] ss:$0 sm:$0xff] }
 0x64f   : > { %v1657_v9 = vsel %vm1190_vm4, %v1655_v5, %v2939_v0  ;;  %v1656_v10 = vsel %vm1190_vm4, %v1654_v6, %v2938_v1 }
 0x654   : > { %v2942_v2 = vpop.permute.xlu1 %2941 }
 0x655   : > { %v2944_v7 = vunpack.i.h.bf16 %v2942_v2  ;;  %v2943_v8 = vunpack.i.l.bf16 %v2942_v2  ;;  %v2685_v2 = vld [vmem:[%s3881_s14] ss:$0 sm:$0xff] }
 0x657   : > { %v1660_v11 = vsel %vm1658_vm5, %v1657_v9, %v2944_v7  ;;  %v1659_v12 = vsel %vm1658_vm5, %v1656_v10, %v2943_v8 }
 0x658   : > { %v1661_v13 = vpack.c.bf16 %v1660_v11, %v1659_v12 }
 0x65a   : > { %2809 = vmatmul.mubr.msk.bf16.vlgmr.msra.gmra.mrb[12].mxu1 %vm1024_vm1, %v1661_v13 }
 0x65b   : > { %2836 = vmatprep.mubr.msk.bf16.mxu1 %vm3121_vm2, %v3120_v18  ;;  %2821 = vmatpush3.bf16.msra.mxu1 %v2951_v53 }
 0x65c   : > { %2822 = vmatprep.subr.bf16.mxu1 %v3120_v18 }
 0x65f   : > { %2823 = vmatpush3.bf16.msra.mxu1 %v2952_v54 }
 0x660   : > { %2824 = vmatprep.subr.bf16.mxu1 %v3120_v18 }
 0x663   : > { %2825 = vmatpush3.bf16.msra.mxu1 %v2953_v55  ;;  %v3136_v55 = vmov -1.0  }
 0x664   : > { %2826 = vmatprep.subr.bf16.mxu1 %v3120_v18 }
 0x667   : > { %2827 = vmatpush3.bf16.msra.mxu1 %v2954_v56 }
 0x668   : > { %2828 = vmatprep.subr.bf16.mxu1 %v3120_v18 }
 0x66b   : > { %2829 = vmatpush3.bf16.msra.mxu1 %v2955_v57 }
 0x66c   : > { %2830 = vmatprep.subr.bf16.mxu1 %v3120_v18 }
 0x66f   : > { %2831 = vmatpush3.bf16.msra.mxu1 %v2956_v58 }
 0x670   : > { %2832 = vmatprep.subr.bf16.mxu1 %v3120_v18 }
 0x673   : > { %2833 = vmatpush3.bf16.msra.mxu1 %v2957_v59 }
 0x674   : > { %2834 = vmatprep.subr.bf16.mxu1 %v3120_v18 }
 0x677   : > { %2835 = vmatpush3.bf16.msra.mxu1 %v2958_v60 }
 0x72d   : > { %v1722_v15 = vpop.f32.mrb[12].mxu1 }
 0x72e   : > { %v1723_v16 = vadd.f32 %v2674_v14, %v1722_v15  ;;  %v2810_v17 = vpop.f32.mrb[13].mxu1 }
 0x72f   : > { %v1725_v44 = vpop.f32.mrb[14].mxu1 }
 0x730   : > { %v3549_v19 = vadd.f32 %v1723_v16, %v3425_v3  ;;  %v1726_v20 = vadd.f32 %v2674_v14, %v1725_v44  ;;  %v2811_v21 = vpop.f32.mrb[15].mxu1 }
 0x732   : > { %v3552_v22 = vadd.f32 %v1726_v20, %v3427_v4  ;;  %v1733_v23 = vsel %vm1024_vm1, %v3549_v19, 0.0 }
 0x733   : > { %1734 = vadd.xlane.f32.xlu0 %v1733_v23 }
 0x734   : > { %v1736_v24 = vsel %vm1024_vm1, %v3552_v22, 0.0 }
 0x735   : > { %1737 = vadd.xlane.f32.xlu1 %v1736_v24 }
 0x7c0   : > { %v1735_v25 = vpop.xlane.xlu0 %1734 }
 0x7c1   : > { %v1739_v26 = vmul.f32 0.03125, %v1735_v25 }
 0x7c2   : > { %v1738_v27 = vpop.xlane.xlu1 %1737 }
 0x7c3   : > { %v1741_v3 = vsub.f32 %v3549_v19, %v1739_v26  ;;  %v1740_v28 = vmul.f32 0.03125, %v1738_v27 }
 0x7c5   : > { %v1742_v29 = vsub.f32 %v3552_v22, %v1740_v28  ;;  %v1743_v4 = vmul.f32 %v1741_v3, %v1741_v3 }
 0x7c7   : > { %v1745_v30 = vsel %vm1024_vm1, %v1743_v4, 0.0  ;;  %v1744_v31 = vmul.f32 %v1742_v29, %v1742_v29 }
 0x7c8   : > { %1746 = vadd.xlane.f32.xlu0 %v1745_v30 }
 0x7c9   : > { %v1748_v32 = vsel %vm1024_vm1, %v1744_v31, 0.0 }
 0x7cc   : > { %1749 = vadd.xlane.f32.xlu0 %v1748_v32 }
 0x855   : > { %v1747_v35 = vpop.xlane.xlu0 %1746 }
 0x856   : > { %v1751_v36 = vmul.f32 0.03125, %v1747_v35 }
 0x858   : > { %v1753_v37 = vadd.f32 1e-06, %v1751_v36 }
 0x859   : > { %v1750_v38 = vpop.xlane.xlu0 %1749 }
 0x85a   : > { %2995 = vrsqrt.f32 %v1753_v37  ;;  %v1752_v39 = vmul.f32 0.03125, %v1750_v38  ;;  %v1930_v37 = vlaneseq }
 0x85c   : > { %v1754_v40 = vadd.f32 1e-06, %v1752_v39 }
 0x85e   : > { %2997 = vrsqrt.f32 %v1754_v40 }
 0x864   : > { %v2996_v41 = vpop.eup %2995 }
 0x865   : > { %v1757_v42 = vmul.f32 %v2996_v41, %v1741_v3 }
 0x867   : > { %v1765_v46 = vmul.f32 %v2678_v43, %v1757_v42  ;;  %v3609_v42 = vshrl.u32 %v1930_v37, 7 }
 0x868   : > { %v2998_v45 = vpop.eup %2997 }
 0x869   : > { %v1758_v47 = vmul.f32 %v2998_v45, %v1742_v29  ;;  %v1773_v50 = vadd.f32 %v2679_v48, %v1765_v46 }
 0x86b   : > { %v1766_v49 = vmul.f32 %v2678_v43, %v1758_v47 }
 0x86d   : > { %v1774_v51 = vadd.f32 %v2679_v48, %v1766_v49  ;;  %v1932_v49 = vsub.s32 0, %v3609_v42 }
 0x86f   : > { %v1775_v52 = vpack.c.bf16 %v1774_v51, %v1773_v50  ;;  %v1944_v50 = vsub.s32 1, %v3609_v42 }
 0x871   : > { %2817 = vmatmul.mubr.msk.bf16.vlgmr.msra.gmra.mrb[24].mxu0 %vm1024_vm1, %v1775_v52  ;;  %v1924_v52 = vld [vmem:[%s3390_s3] sm:$0xff] }
 0x872   : > { %v1933_v59 = vrot.slane %v1924_v52, %v1932_v49  ;;  %v1945_v60 = vrot.slane %v1924_v52, %v1944_v50 }
 0x944   : > { %v1836_v62 = vpop.f32.mrb[24].mxu0 }
 0x945   : > { %v1837_v0 = vadd.f32 %v2680_v61, %v1836_v62  ;;  %v2818_v1 = vpop.f32.mrb[25].mxu0  ;;  %v1926_v62 = vld [vmem:[#allocation3] sm:$0xf] }
 0x946   : > { %v1839_v18 = vpop.f32.mrb[26].mxu0 }
 0x947   : > { %v1850_v5 = vmul.f32 %v2684_v63, %v1837_v0  ;;  %v1840_v6 = vadd.f32 %v2680_v61, %v1839_v18  ;;  %v2819_v7 = vpop.f32.mrb[27].mxu0  ;;  %v1960_v0 = vsub.s32 2, %v3609_v42 }
 0x948   : > { %v1934_v7 = vmul.f32 %v1933_v59, %v1926_v62 }
 0x949   : > { %v1859_v8 = vadd.f32 %v2685_v2, %v1850_v5  ;;  %v1851_v9 = vmul.f32 %v2684_v63, %v1840_v6  ;;  %v1938_v63 = vld [vmem:[#allocation3 + $0x1] sm:$0xf] }
 0x94b   : > { %v1863_v10 = vmul.f32 0.70710677, %v1859_v8  ;;  %v3606_v11 = vadd.f32 %v2685_v2, %v1851_v9  ;;  %v1861_v1 = vmul.f32 0.5, %v1859_v8  ;;  %v1946_v9 = vmul.f32 %v1945_v60, %v1938_v63 }
 0x94d   : > { %v1869_v12 = vand.u32 2147483647, %v1863_v10  ;;  %v1864_v13 = vmul.f32 0.70710677, %v3606_v11  ;;  %vm1865_vm6 = vcmp.ge.f32.partialorder %v1863_v10, 0.0  ;;  %v1862_v10 = vmul.f32 0.5, %v3606_v11 }
 0x94e   : > { %v1867_v56 = vsel %vm1865_vm6, 1.0, %v3136_v55  ;;  %v2008_v11 = vsub.s32 5, %v3609_v42 }
 0x94f   : > { %v1871_v14 = vmul.f32 0.3275911, %v1869_v12  ;;  %v1870_v15 = vand.u32 2147483647, %v1864_v13  ;;  %v1895_v20 = vsub.f32 0.0, %v1869_v12  ;;  %vm1866_vm7 = vcmp.ge.f32.partialorder %v1864_v13, 0.0 }
 0x950   : > { %v1868_v18 = vsel %vm1866_vm7, 1.0, %v3136_v55  ;;  %v1961_v13 = vrot.slane %v1924_v52, %v1960_v0 }
 0x951   : > { %v1873_v16 = vadd.f32 1.0, %v1871_v14  ;;  %v1872_v17 = vmul.f32 0.3275911, %v1870_v15  ;;  %v1896_v21 = vsub.f32 0.0, %v1870_v15  ;;  %v1897_v24 = vmul.f32 %v1895_v20, %v1869_v12 }
 0x953   : > { %2999 = vrcp.f32 %v1873_v16  ;;  %v1874_v44 = vadd.f32 1.0, %v1872_v17  ;;  %v1898_v3 = vmul.f32 %v1896_v21, %v1870_v15  ;;  %v1899_v28 = vmul.f32 1.442695, %v1897_v24  ;;  %v1954_v15 = vld [vmem:[#allocation3 + $0x2] sm:$0xf] }
 0x954   : > { %v1976_v17 = vsub.s32 3, %v3609_v42  ;;  %v1962_v20 = vmul.f32 %v1961_v13, %v1954_v15  ;;  %v1992_v21 = vsub.s32 4, %v3609_v42 }
 0x955   : > { %3001 = vrcp.f32 %v1874_v44  ;;  %v1901_v32 = vmul.f32 1.442695, %v1898_v3  ;;  %v1950_v44 = vadd.f32 %v1946_v9, %v1934_v7 }
 0x956   : > { %3003 = vpow2.f32 %v1899_v28  ;;  %v1977_v24 = vrot.slane %v1924_v52, %v1976_v17 }
 0x957   : > { %3005 = vpow2.f32 %v1901_v32 }
 0x95d   : > { %v3000_v23 = vpop.eup %2999 }
 0x95e   : > { %v1877_v25 = vmul.f32 1.0614054, %v3000_v23 }
 0x95f   : > { %v3002_v26 = vpop.eup %3001 }
 0x960   : > { %v1879_v27 = vadd.f32 -1.4531521, %v1877_v25  ;;  %v1878_v29 = vmul.f32 1.0614054, %v3002_v26  ;;  %v3004_v46 = vpop.eup %3003  ;;  %v2041_v25 = vsub.s32 7, %v3609_v42 }
 0x961   : > { %v3006_v53 = vpop.eup %3005 }
 0x962   : > { %v1881_v4 = vmul.f32 %v3000_v23, %v1879_v27  ;;  %v1880_v30 = vadd.f32 -1.4531521, %v1878_v29  ;;  %v1966_v29 = vadd.f32 %v1962_v20, %v1950_v44 }
 0x964   : > { %v1883_v31 = vadd.f32 1.4214138, %v1881_v4  ;;  %v1882_v33 = vmul.f32 %v3002_v26, %v1880_v30  ;;  %v1993_v4 = vrot.slane %v1924_v52, %v1992_v21 }
 0x966   : > { %v1885_v34 = vmul.f32 %v3000_v23, %v1883_v31  ;;  %v1884_v35 = vadd.f32 1.4214138, %v1882_v33 }
 0x968   : > { %v1887_v36 = vadd.f32 -0.28449672, %v1885_v34  ;;  %v1886_v38 = vmul.f32 %v3002_v26, %v1884_v35 }
 0x96a   : > { %v1889_v39 = vmul.f32 %v3000_v23, %v1887_v36  ;;  %v1888_v40 = vadd.f32 -0.28449672, %v1886_v38 }
 0x96c   : > { %v1891_v41 = vadd.f32 0.2548296, %v1889_v39  ;;  %v1890_v43 = vmul.f32 %v3002_v26, %v1888_v40  ;;  %v2009_v40 = vrot.slane %v1924_v52, %v2008_v11 }
 0x96e   : > { %v1893_v45 = vmul.f32 %v3000_v23, %v1891_v41  ;;  %v1892_v47 = vadd.f32 0.2548296, %v1890_v43  ;;  %v2025_v23 = vsub.s32 6, %v3609_v42  ;;  %v3628_v42 = vrot.slane %v1924_v52, %v2041_v25 }
 0x970   : > { %v1903_v48 = vmul.f32 %v3004_v46, %v1893_v45  ;;  %v1894_v51 = vmul.f32 %v3002_v26, %v1892_v47  ;;  %v2022_v26 = vld [vmem:[#allocation3 + $0x28] sm:$0xf]  ;;  %v3623_v30 = vrot.slane %v1924_v52, %v2025_v23 }
 0x972   : > { %v1905_v54 = vsub.f32 1.0, %v1903_v48  ;;  %v1904_v57 = vmul.f32 %v3006_v53, %v1894_v51  ;;  %v3626_v41 = vmul.f32 %v3623_v30, %v2022_v26 }
 0x974   : > { %v1907_v58 = vmul.f32 %v1905_v54, %v1867_v56  ;;  %v1906_v61 = vsub.f32 1.0, %v1904_v57 }
 0x976   : > { %v1909_v2 = vadd.f32 1.0, %v1907_v58  ;;  %v1908_v5 = vmul.f32 %v1906_v61, %v1868_v18 }
 0x978   : > { %v1911_v6 = vmul.f32 %v1909_v2, %v1861_v1  ;;  %v1910_v12 = vadd.f32 1.0, %v1908_v5 }
 0x97a   : > { %v1915_v14 = vcombine.high %v1911_v6, %v1911_v6  ;;  %1920 = vst [vmem:[#allocation3 + $0x9] sm:$0xf] %v1911_v6  ;;  %v1912_v16 = vmul.f32 %v1910_v12, %v1862_v10 }
 0x97c   : > { %1921 = vst [vmem:[#allocation3 + $0x11] sm:$0xf] %v1915_v14  ;;  %v1916_v8 = vcombine.high %v1912_v16, %v1912_v16  ;;  %1922 = vst [vmem:[#allocation3 + $0x19] sm:$0xf] %v1912_v16 }
 0x97e   : > { %1923 = vst [vmem:[#allocation3 + $0x21] sm:$0xf] %v1916_v8 }
 0x981   : > { %v1927_v27 = vld [vmem:[#allocation3 + $0x8] sm:$0xf] }
 0x982   : > { %v1939_v3 = vld [vmem:[#allocation3 + $0x9] sm:$0xf]  ;;  %v1935_v31 = vmul.f32 %v1933_v59, %v1927_v27 }
 0x983   : > { %v1955_v28 = vld [vmem:[#allocation3 + $0xa] sm:$0xf]  ;;  %v1947_v32 = vmul.f32 %v1945_v60, %v1939_v3  ;;  %v1928_v36 = vld [vmem:[#allocation3 + $0x10] sm:$0xf]  ;;  %v1929_v43 = vld [vmem:[#allocation3 + $0x18] sm:$0xf] }
 0x984   : > { %v1970_v33 = vld [vmem:[#allocation3 + $0x8] sm:$0xf]  ;;  %v1940_v37 = vld [vmem:[#allocation3 + $0x11] sm:$0xf]  ;;  %v1936_v45 = vmul.f32 %v1933_v59, %v1928_v36  ;;  %v1941_v46 = vld [vmem:[#allocation3 + $0x19] sm:$0xf]  ;;  %v1963_v50 = vmul.f32 %v1961_v13, %v1955_v28  ;;  %v1937_v51 = vmul.f32 %v1933_v59, %v1929_v43 }
 0x985   : > { %v1986_v34 = vld [vmem:[#allocation3 + $0x9] sm:$0xf]  ;;  %v1956_v38 = vld [vmem:[#allocation3 + $0x12] sm:$0xf]  ;;  %v1978_v39 = vmul.f32 %v1977_v24, %v1970_v33  ;;  %v1948_v47 = vmul.f32 %v1945_v60, %v1940_v37  ;;  %v1951_v48 = vadd.f32 %v1947_v32, %v1935_v31  ;;  %v1957_v49 = vld [vmem:[#allocation3 + $0x1a] sm:$0xf]  ;;  %v1949_v53 = vmul.f32 %v1945_v60, %v1941_v46 }
 0x986   : > { %v2002_v35 = vld [vmem:[#allocation3 + $0xa] sm:$0xf]  ;;  %v1971_v54 = vld [vmem:[#allocation3 + $0x10] sm:$0xf]  ;;  %v1972_v56 = vld [vmem:[#allocation3 + $0x18] sm:$0xf]  ;;  %v1994_v61 = vmul.f32 %v1993_v4, %v1986_v34  ;;  %v1964_v63 = vmul.f32 %v1961_v13, %v1956_v38  ;;  %v1965_v5 = vmul.f32 %v1961_v13, %v1957_v49 }
 0x987   : > { %v1982_v57 = vadd.f32 %v1978_v39, %v1966_v29  ;;  %v1987_v58 = vld [vmem:[#allocation3 + $0x11] sm:$0xf]  ;;  %v1952_v62 = vadd.f32 %v1948_v47, %v1936_v45  ;;  %v1967_v0 = vadd.f32 %v1963_v50, %v1951_v48  ;;  %v1973_v1 = vld [vmem:[#allocation3 + $0x20] sm:$0xf]  ;;  %v1979_v52 = vmul.f32 %v1977_v24, %v1971_v54  ;;  %v1988_v2 = vld [vmem:[#allocation3 + $0x19] sm:$0xf] }
 0x988   : > { %v1953_v18 = vadd.f32 %v1949_v53, %v1937_v51  ;;  %v1980_v6 = vmul.f32 %v1977_v24, %v1972_v56  ;;  %v1989_v7 = vld [vmem:[#allocation3 + $0x21] sm:$0xf]  ;;  %v2003_v9 = vld [vmem:[#allocation3 + $0x12] sm:$0xf]  ;;  %v2010_v10 = vmul.f32 %v2009_v40, %v2002_v35  ;;  %v1995_v60 = vmul.f32 %v1993_v4, %v1987_v58  ;;  %v2004_v15 = vld [vmem:[#allocation3 + $0x1a] sm:$0xf] }
 0x989   : > { %v1968_v12 = vadd.f32 %v1964_v63, %v1952_v62  ;;  %v1983_v59 = vadd.f32 %v1979_v52, %v1967_v0  ;;  %v1998_v14 = vadd.f32 %v1994_v61, %v1982_v57  ;;  %v2019_v16 = vld [vmem:[#allocation3 + $0x10] sm:$0xf]  ;;  %v2020_v17 = vld [vmem:[#allocation3 + $0x18] sm:$0xf]  ;;  %v1981_v8 = vmul.f32 %v1977_v24, %v1973_v1  ;;  %v2005_v13 = vld [vmem:[#allocation3 + $0x22] sm:$0xf] }
 0x98a   : > { %v1969_v44 = vadd.f32 %v1965_v5, %v1953_v18  ;;  %v1996_v20 = vmul.f32 %v1993_v4, %v1988_v2  ;;  %v2011_v21 = vmul.f32 %v2009_v40, %v2003_v9  ;;  %v2035_v23 = vld [vmem:[#allocation3 + $0x11] sm:$0xf]  ;;  %v2021_v27 = vld [vmem:[#allocation3 + $0x20] sm:$0xf]  ;;  %v2027_v3 = vmul.f32 %v3623_v30, %v2019_v16  ;;  %v2036_v28 = vld [vmem:[#allocation3 + $0x19] sm:$0xf] }
 0x98b   : > { %v1984_v11 = vadd.f32 %v1980_v6, %v1968_v12  ;;  %v1999_v25 = vadd.f32 %v1995_v60, %v1983_v59  ;;  %v2014_v26 = vadd.f32 %v2010_v10, %v1998_v14  ;;  %v2686_v29 = vld [vmem:[%s3390_s3 + $0x8] ss:$0 sm:$0xff]  ;;  %v1997_v32 = vmul.f32 %v1993_v4, %v1989_v7  ;;  %v2051_v35 = vld [vmem:[#allocation3 + $0x12] sm:$0xf]  ;;  %v2037_v38 = vld [vmem:[#allocation3 + $0x21] sm:$0xf] }
 0x98c   : > { %v1985_v31 = vadd.f32 %v1981_v8, %v1969_v44  ;;  %v2012_v33 = vmul.f32 %v2009_v40, %v2004_v15  ;;  %v2028_v34 = vmul.f32 %v3623_v30, %v2020_v17  ;;  %v2038_v39 = vld [vmem:[#allocation3 + $0x29] sm:$0xf]  ;;  %v2043_v43 = vmul.f32 %v3628_v42, %v2035_v23  ;;  %v2052_v49 = vld [vmem:[#allocation3 + $0x1a] sm:$0xf]  ;;  %v2687_v56 = vld [vmem:[%s3883_s6] ss:$0 sm:$0xff] }
 0x98d   : > { %v2000_v36 = vadd.f32 %v1996_v20, %v1984_v11  ;;  %v2015_v24 = vadd.f32 %v2011_v21, %v1999_v25  ;;  %v2031_v37 = vadd.f32 %v2027_v3, %v2014_v26  ;;  %v2013_v46 = vmul.f32 %v2009_v40, %v2005_v13  ;;  %v2054_v53 = vld [vmem:[#allocation3 + $0x2a] sm:$0xf]  ;;  %v2688_v52 = vld [vmem:[%s3885_s24] ss:$0 sm:$0xff] }
 0x98e   : > { %v2001_v45 = vadd.f32 %v1997_v32, %v1985_v31  ;;  %v2029_v47 = vmul.f32 %v3623_v30, %v2021_v27  ;;  %v2044_v48 = vmul.f32 %v3628_v42, %v2036_v28  ;;  %v2059_v54 = vmul.f32 %v2686_v29, %v2051_v35  ;;  %v2053_v30 = vld [vmem:[#allocation3 + $0x22] sm:$0xf]  ;;  %v2689_v12 = vld [vmem:[%s989_s4] ss:$0 sm:$0xff] }
 0x98f   : > { %v2016_v4 = vadd.f32 %v2012_v33, %v2000_v36  ;;  %v2032_v50 = vadd.f32 %v2028_v34, %v2015_v24  ;;  %v2047_v51 = vadd.f32 %v2043_v43, %v2031_v37  ;;  %v2045_v58 = vmul.f32 %v3628_v42, %v2037_v38 }
 0x990   : > { %v2017_v57 = vadd.f32 %v2013_v46, %v2001_v45  ;;  %v2046_v40 = vmul.f32 %v3628_v42, %v2038_v39  ;;  %v2074_v61 = vcombine.high %v2687_v56, %v2687_v56  ;;  %v2060_v0 = vmul.f32 %v2686_v29, %v2052_v49 }
 0x991   : > { %v2033_v62 = vadd.f32 %v2029_v47, %v2016_v4  ;;  %v2048_v63 = vadd.f32 %v2044_v48, %v2032_v50  ;;  %v2063_v1 = vadd.f32 %v2059_v54, %v2047_v51  ;;  %v2062_v18 = vmul.f32 %v2686_v29, %v2054_v53 }
 0x992   : > { %v2034_v2 = vadd.f32 %v3626_v41, %v2017_v57  ;;  %v2087_v5 = vcombine.high %v2688_v52, %v2688_v52  ;;  %v2061_v7 = vmul.f32 %v2686_v29, %v2053_v30  ;;  %v2100_v15 = vcombine.high %v2689_v12, %v2689_v12 }
 0x993   : > { %v2049_v6 = vadd.f32 %v2045_v58, %v2033_v62  ;;  %v2064_v9 = vadd.f32 %v2060_v0, %v2048_v63  ;;  %v2076_v42 = vadd.f32 %v2687_v56, %v2063_v1 }
 0x994   : > { %v2050_v10 = vadd.f32 %v2046_v40, %v2034_v2 }
 0x995   : > { %v2065_v59 = vadd.f32 %v2061_v7, %v2049_v6  ;;  %v2077_v60 = vadd.f32 %v2074_v61, %v2064_v9  ;;  %v2089_v14 = vmul.f32 %v2688_v52, %v2076_v42 }
 0x996   : > { %v2066_v16 = vadd.f32 %v2062_v18, %v2050_v10 }
 0x997   : > { %v2078_v17 = vadd.f32 %v2687_v56, %v2065_v59  ;;  %v2090_v44 = vmul.f32 %v2087_v5, %v2077_v60  ;;  %v3654_v41 = vadd.f32 %v2689_v12, %v2089_v14 }
 0x998   : > { %v2079_v8 = vadd.f32 %v2074_v61, %v2066_v16 }
 0x999   : > { %v2091_v20 = vmul.f32 %v2688_v52, %v2078_v17  ;;  %v3656_v21 = vadd.f32 %v2100_v15, %v2090_v44  ;;  %v3659_v23 = vmul.f32 0.70710677, %v3654_v41 }
 0x99a   : > { %v2092_v11 = vmul.f32 %v2087_v5, %v2079_v8 }
 0x99b   : > { %v3661_v25 = vadd.f32 %v2689_v12, %v2091_v20  ;;  %v3664_v13 = vmul.f32 0.70710677, %v3656_v21  ;;  %v2122_v27 = vand.u32 2147483647, %v3659_v23  ;;  %vm2114_vm8 = vcmp.ge.f32.partialorder %v3659_v23, 0.0 }
 0x99c   : > { %v3666_v26 = vadd.f32 %v2100_v15, %v2092_v11 }
 0x99d   : > { %v3670_v3 = vmul.f32 0.70710677, %v3661_v25  ;;  %v2123_v28 = vand.u32 2147483647, %v3664_v13  ;;  %v2126_v31 = vmul.f32 0.3275911, %v2122_v27 }
 0x99e   : > { %v3674_v29 = vmul.f32 0.70710677, %v3666_v26  ;;  %v2174_v43 = vsub.f32 0.0, %v2122_v27  ;;  %vm2115_vm9 = vcmp.ge.f32.partialorder %v3664_v13, 0.0 }
 0x99f   : > { %v2124_v32 = vand.u32 2147483647, %v3670_v3  ;;  %v2127_v33 = vmul.f32 0.3275911, %v2123_v28  ;;  %v2130_v35 = vadd.f32 1.0, %v2126_v31  ;;  %v2175_v45 = vsub.f32 0.0, %v2123_v28 }
 0x9a0   : > { %v2125_v34 = vand.u32 2147483647, %v3674_v29  ;;  %v2178_v49 = vmul.f32 %v2174_v43, %v2122_v27  ;;  %vm2116_vm10 = vcmp.ge.f32.partialorder %v3670_v3, 0.0  ;;  %vm2117_vm11 = vcmp.ge.f32.partialorder %v3674_v29, 0.0 }
 0x9a1   : > { %v2128_v36 = vmul.f32 0.3275911, %v2124_v32  ;;  %v2131_v24 = vadd.f32 1.0, %v2127_v33  ;;  %3007 = vrcp.f32 %v2130_v35  ;;  %v2176_v46 = vsub.f32 0.0, %v2124_v32 }
 0x9a2   : > { %v2129_v37 = vmul.f32 0.3275911, %v2125_v34  ;;  %v2177_v48 = vsub.f32 0.0, %v2125_v34  ;;  %v2179_v51 = vmul.f32 %v2175_v45, %v2123_v28  ;;  %v2182_v62 = vmul.f32 1.442695, %v2178_v49 }
 0x9a3   : > { %v2132_v38 = vadd.f32 1.0, %v2128_v36  ;;  %3009 = vrcp.f32 %v2131_v24  ;;  %v2180_v57 = vmul.f32 %v2176_v46, %v2124_v32  ;;  %v2119_v23 = vsel %vm2115_vm9, 1.0, %v3136_v55 }
 0x9a4   : > { %v2133_v39 = vadd.f32 1.0, %v2129_v37  ;;  %v2181_v61 = vmul.f32 %v2177_v48, %v2125_v34  ;;  %v2184_v1 = vmul.f32 1.442695, %v2179_v51  ;;  %v2107_v3 = vmul.f32 0.5, %v3656_v21 }
 0x9a5   : > { %3011 = vrcp.f32 %v2132_v38  ;;  %v2186_v6 = vmul.f32 1.442695, %v2180_v57  ;;  %v2108_v29 = vmul.f32 0.5, %v3661_v25  ;;  %v2690_v25 = vld [vmem:[%s997_s13] ss:$0 sm:$0xff]  ;;  %s3889_s13 = sld [smem:[#allocation10_spill]] }
 0x9a6   : > { %3013 = vrcp.f32 %v2133_v39  ;;  %v2188_v42 = vmul.f32 1.442695, %v2181_v61 }
 0x9a7   : > { %3015 = vpow2.f32 %v2182_v62 }
 0x9a8   : > { %3017 = vpow2.f32 %v2184_v1  ;;  %v2106_v1 = vmul.f32 0.5, %v3654_v41  ;;  %v2699_v41 = vld [vmem:[%s1000_s15] ss:$0 sm:$0xff] }
 0x9a9   : > { %3019 = vpow2.f32 %v2186_v6 }
 0x9aa   : > { %3021 = vpow2.f32 %v2188_v42 }
 0x9ab   : > { %v3008_v47 = vpop.eup %3007  ;;  %p2701_p1 = scmp.ne.s32.totalorder %s3889_s13, 1 }
 0x9ac   : > { %v2138_v50 = vmul.f32 1.0614054, %v3008_v47 }
 0x9ad   : > { %v3010_v4 = vpop.eup %3009 }
 0x9ae   : > { %v2139_v53 = vmul.f32 1.0614054, %v3010_v4  ;;  %v2142_v56 = vadd.f32 -1.4531521, %v2138_v50 }
 0x9af   : > { %v3012_v54 = vpop.eup %3011 }
 0x9b0   : > { %v3014_v58 = vpop.eup %3013  ;;  %v2140_v40 = vmul.f32 1.0614054, %v3012_v54  ;;  %v2143_v30 = vadd.f32 -1.4531521, %v2139_v53  ;;  %v2146_v0 = vmul.f32 %v3008_v47, %v2142_v56 }
 0x9b1   : > { %v2141_v63 = vmul.f32 1.0614054, %v3014_v58  ;;  %v3016_v35 = vpop.eup %3015 }
 0x9b2   : > { %v2144_v52 = vadd.f32 -1.4531521, %v2140_v40  ;;  %v2147_v2 = vmul.f32 %v3010_v4, %v2143_v30  ;;  %v2150_v5 = vadd.f32 1.4214138, %v2146_v0  ;;  %v3018_v37 = vpop.eup %3017 }
 0x9b3   : > { %v2145_v18 = vadd.f32 -1.4531521, %v2141_v63  ;;  %v3020_v46 = vpop.eup %3019 }
 0x9b4   : > { %v2148_v7 = vmul.f32 %v3012_v54, %v2144_v52  ;;  %v2151_v9 = vadd.f32 1.4214138, %v2147_v2  ;;  %v2154_v12 = vmul.f32 %v3008_v47, %v2150_v5  ;;  %v3022_v50 = vpop.eup %3021  ;;  %v2109_v52 = vmul.f32 0.5, %v3666_v26 }
 0x9b5   : > { %v2149_v10 = vmul.f32 %v3014_v58, %v2145_v18 }
 0x9b6   : > { %v2152_v59 = vadd.f32 1.4214138, %v2148_v7  ;;  %v2155_v60 = vmul.f32 %v3010_v4, %v2151_v9  ;;  %v2158_v15 = vadd.f32 -0.28449672, %v2154_v12  ;;  %v2700_v12 = vld [vmem:[%s1003_s16] ss:$0 sm:$0xff] }
 0x9b7   : > { %v2153_v14 = vadd.f32 1.4214138, %v2149_v10 }
 0x9b8   : > { %v2156_v16 = vmul.f32 %v3012_v54, %v2152_v59  ;;  %v2159_v17 = vadd.f32 -0.28449672, %v2155_v60  ;;  %v2162_v8 = vmul.f32 %v3008_v47, %v2158_v15 }
 0x9b9   : > { %v2157_v44 = vmul.f32 %v3014_v58, %v2153_v14 }
 0x9ba   : > { %v2160_v20 = vadd.f32 -0.28449672, %v2156_v16  ;;  %v2163_v11 = vmul.f32 %v3010_v4, %v2159_v17  ;;  %v2166_v28 = vadd.f32 0.2548296, %v2162_v8 }
 0x9bb   : > { %v2161_v27 = vadd.f32 -0.28449672, %v2157_v44 }
 0x9bc   : > { %v2164_v31 = vmul.f32 %v3012_v54, %v2160_v20  ;;  %v2167_v32 = vadd.f32 0.2548296, %v2163_v11  ;;  %v2170_v34 = vmul.f32 %v3008_v47, %v2166_v28  ;;  %v2118_v47 = vsel %vm2114_vm8, 1.0, %v3136_v55 }
 0x9bd   : > { %v2165_v33 = vmul.f32 %v3014_v58, %v2161_v27 }
 0x9be   : > { %v2168_v36 = vadd.f32 0.2548296, %v2164_v31  ;;  %v2171_v24 = vmul.f32 %v3010_v4, %v2167_v32  ;;  %v2190_v39 = vmul.f32 %v3016_v35, %v2170_v34 }
 0x9bf   : > { %v2169_v38 = vadd.f32 0.2548296, %v2165_v33 }
 0x9c0   : > { %v2172_v43 = vmul.f32 %v3012_v54, %v2168_v36  ;;  %v2191_v45 = vmul.f32 %v3018_v37, %v2171_v24  ;;  %v2194_v49 = vsub.f32 1.0, %v2190_v39  ;;  %v2120_v54 = vsel %vm2116_vm10, 1.0, %v3136_v55 }
 0x9c1   : > { %v2173_v48 = vmul.f32 %v3014_v58, %v2169_v38  ;;  %v2121_v58 = vsel %vm2117_vm11, 1.0, %v3136_v55 }
 0x9c2   : > { %v2192_v51 = vmul.f32 %v3020_v46, %v2172_v43  ;;  %v2195_v53 = vsub.f32 1.0, %v2191_v45  ;;  %v2198_v56 = vmul.f32 %v2194_v49, %v2118_v47 }
 0x9c3   : > { %v2193_v4 = vmul.f32 %v3022_v50, %v2173_v48 }
 0x9c4   : > { %v2196_v57 = vsub.f32 1.0, %v2192_v51  ;;  %v2199_v13 = vmul.f32 %v2195_v53, %v2119_v23  ;;  %v2202_v63 = vadd.f32 1.0, %v2198_v56 }
 0x9c5   : > { %v2197_v40 = vsub.f32 1.0, %v2193_v4 }
 0x9c6   : > { %v2200_v30 = vmul.f32 %v2196_v57, %v2120_v54  ;;  %v2203_v61 = vadd.f32 1.0, %v2199_v13  ;;  %v2206_v55 = vmul.f32 %v2202_v63, %v2106_v1 }
 0x9c7   : > { %v2201_v62 = vmul.f32 %v2197_v40, %v2121_v58 }
 0x9c8   : > { %v2204_v0 = vadd.f32 1.0, %v2200_v30  ;;  %v2207_v18 = vmul.f32 %v2203_v61, %v2107_v3 }
 0x9c9   : > { %v2205_v2 = vadd.f32 1.0, %v2201_v62 }
 0x9ca   : > { %v2208_v5 = vmul.f32 %v2204_v0, %v2108_v29  ;;  %v2214_v7 = vcombine.low %v2206_v55, %v2207_v18 }
 0x9cb   : > { %v2209_v6 = vmul.f32 %v2205_v2, %v2109_v52 }
 0x9cd   : > { %v2215_v9 = vcombine.low %v2208_v5, %v2209_v6 }
 0x9cf   : > { %v2218_v21 = vpack.c.bf16 %v2215_v9, %v2214_v7 }
 0x9d1   : > { %2837 = vmatmul.mubr.bf16.vlgmr.msra.gmra.mrb[16].mxu1 %v2218_v21 }
 0xaa4   : > { %v2324_v42 = vpop.f32.mrb[16].mxu1 }
 0xaa5   : > { %v2325_v26 = vadd.f32 %v2690_v25, %v2324_v42  ;;  %v2838_v10 = vpop.f32.mrb[17].mxu1 }
 0xaa6   : > { %v2327_v59 = vpop.f32.mrb[18].mxu1 }
 0xaa7   : > { %v2338_v60 = vmul.f32 %v2699_v41, %v2325_v26  ;;  %v2328_v14 = vadd.f32 %v2690_v25, %v2327_v59  ;;  %v2839_v15 = vpop.f32.mrb[19].mxu1 }
 0xaa9   : > { %v2347_v16 = vadd.f32 %v2700_v12, %v2338_v60  ;;  %v2339_v17 = vmul.f32 %v2699_v41, %v2328_v14  ;;  %2356 = sbr.rel (%p2701_p1) target bundleno = 2736 (0xab0), region = 116 }
 0xaab   : > { %v2349_v44 = vadd.f32 %v2347_v16, %v3549_v19  ;;  %v2348_v8 = vadd.f32 %v2700_v12, %v2339_v17 }
 0xaad   : > { %2351 = vst.msk [vmem:[#allocation2] sm:$0xff] %vm1024_vm1, %v2349_v44  ;;  %v2350_v20 = vadd.f32 %v2348_v8, %v3552_v22  ;;  %2357 = vst.msk [vmem:[%s3422_s5] sm:$0xff] (!%p2701_p1), %vm1024_vm1, %v2349_v44 }
 0xaaf   : > { %2352 = vst.msk [vmem:[#allocation2 + $0x8] sm:$0xff] %vm1024_vm1, %v2350_v20  ;;  %2358 = vst.msk [vmem:[%s3422_s5 + $0x8] sm:$0xff] (!%p2701_p1), %vm1024_vm1, %v2350_v20 }
 0xab0 PF: > { %s3890_s15 = sld [smem:[#allocation11_spill]]  ;;  %s3891_s16 = sld [smem:[#allocation8_spill]] }
 0xab1   : > { %s3893_s10 = sld [smem:[#allocation37_spill]]  ;;  %s2373_s28 = sshll.u32 %s3422_s5, 4  ;;  %s3721_s28 = int_to_ptr.vmem [resolvable:$true] %s2373_s28 }
 0xab2   : > { %s3023_s24 = scalar_lea.vmem %s3721_s28, 256  ;;  %s3137_s26 = smov [#allocation4]  }
 0xab3   : > { %p3024_p2 = scmp.ne.s32.totalorder %s3721_s28, %s3023_s24  ;;  %s3027_s25 = sshll.u32 %s3137_s26, 4  ;;  %s3028_s25 = int_to_ptr.vmem [resolvable:$false] %s3027_s25 }
 0xab4   : > { %s3029_s4 = scalar_lea.vmem %s3028_s25, 512  ;;  %p3030_p6 = scmp.lt.s32.totalorder %s3721_s28, %s3028_s25 }
 0xab5   : > { %p3025_p4 = pnand %p3024_p2, %p3303_p3  ;;  %p3031_p7 = scmp.lt.s32.totalorder %s3029_s4, %s3023_s24 }
 0xab6   : > { %s2713_s14 = sshll.u32 %s3890_s15, 8  ;;  %s3894_s29 = sand.u32 1, %s3891_s16  }
 0xab7   : > { %s3718_s6 = scalar_lea.hbm %s3893_s10, %s2713_s14  ;;  %s3725_s0 = scalar_lea.sflag [#allocation5], %s3894_s29 }
 0xab8   : > { %p3026_p5 = pneg %p3025_p4  ;;  %p3032_p8 = por %p3031_p7, %p3030_p6 }
 0xaba   : > { %p3033_p10 = pnand %p3032_p8, %p3026_p5 }
 0xabc   : > { %3036 = shalt.err (!%p3033_p10)
}
 0xabd   : > { %s3037_s5 = scalar_lea.hbm %s3718_s6, 256  ;;  %s3041_s7 = scalar_lea.hbm %s3893_s10, 512 }
 0xabe   : > { %p3038_p11 = scmp.ne.s32.totalorder %s3718_s6, %s3037_s5  ;;  %p3042_p0 = scmp.lt.u32.totalorder %s3718_s6, %s3893_s10 }
 0xabf   : > { %p3043_p1 = scmp.lt.u32.totalorder %s3041_s7, %s3037_s5  ;;  %p3045_p4 = scmp.lt.u32.totalorder %s3037_s5, %s3718_s6 }
 0xac0   : > { %p3039_p12 = pnand %p3038_p11, %p3303_p3 }
 0xac1   : > { %p3044_p2 = por %p3043_p1, %p3042_p0 }
 0xac2   : > { %p3040_p13 = pneg %p3039_p12 }
 0xac3   : > { %p3046_p5 = por %p3045_p4, %p3044_p2 }
 0xac5   : > { %p3047_p6 = pnand %p3046_p5, %p3040_p13 }
 0xac7   : > { %3050 = shalt.err (!%p3047_p6)
}
 0xac8   : > { %s3138_s19 = smov 128  }
 0xac9   : > { %2840 = dma.vmem_to_hbm [thread:$0]  (%p3303_p3), %s3721_s28, 256, %s3718_s6, %s3725_s0, %s3138_s19, %s3138_s19, %s3133_s20  }
 0xaca PF: > { %s3895_s22 = sld [smem:[#allocation14_spill]]  ;;  %s3896_s23 = sld [smem:[#allocation7_spill]] }
 0xad0   : > { %p2846_p7 = scmp.ge.s32.totalorder %s3895_s22, 2  ;;  %s2388_s15 = sand.u32 1, %s3896_s23  }
 0xad1   : > { %s2389_s16 = scalar_lea.sflag [#allocation5], %s2388_s15 }
 0xad2   : > { %p2843_p8 = pnand %p2846_p7, %p3313_p9 }
 0xad4   : > { %3084 = dma.done.wait (!%p2843_p8), %s2389_s16, 256  }
 0xad5   : > { %3086 = vsyncadd (!%p2843_p8), %s2389_s16, 4294967040  ;;  %s35_s1 = sadd.s32 1, %s3895_s22   ;;  %s3898_s3 = sld [smem:[#allocation8_spill]] }
 0xad6   : > { %p32_p10 = scmp.ge.s32.totalorder %s35_s1, 6   ;;  %s3899_s28 = sld [smem:[#allocation9_spill]] }
 0xad7   : > { %s3900_s29 = sld [smem:[#allocation19_spill]]  ;;  %s3901_s30 = sld [smem:[#allocation12_spill]] }
 0xad8   : > { %s3902_s4 = sld [smem:[#allocation13_spill]]  ;;  %s3903_s0 = sld [smem:[#allocation15_spill]] }
 0xad9   : > { %s3904_s23 = sld [smem:[#allocation17_spill]]  ;;  %34 = sbr.rel (!%p32_p10) target bundleno = 23 (0x17), region = 213 }
 0xae0   :  { %2394 = vsyncpa [#allocation5], 1 }
 0xae1   :  { %2396 = vsyncpa [#allocation5 + $0x1], 1 }

</bundles_post_ra>
